<compile_context>
chip_gen: v6e
topology: v6e:2x2x1
jax: 0.10.0
libtpu: 0.0.40
codegen_flags: <defaults>
</compile_context>

<pallas_src>
import functools
import math

import jax
import jax.numpy as jnp
from jax import lax
from jax.experimental import pallas as pl
from jax.experimental.pallas import tpu as pltpu

LANES = 128      # channel slabs padded to 128 lanes (lane-dense stores, full MXU width)
ROW_PAD = 16     # node counts padded to a multiple of 16 (bf16 sublane packing)


def _round_up(v, m):
    return (v + m - 1) // m * m


def _pad2d(a, rows, cols):
    return jnp.pad(a, ((0, rows - a.shape[0]), (0, cols - a.shape[1])))


# ----------------------------------------------------------------------------
# Fused Pallas kernel: the whole GraphUNet forward (compute_loss=False path).
# ----------------------------------------------------------------------------
def _graph_unet_kernel(adj_ref, x_ref, wn_ref, wr_ref, b_ref, o_ref, *,
                       depth, n0, k, npad, kpad):
    f32, bf16 = jnp.float32, jnp.bfloat16
    cp = LANES

    def sage(adj, x, layer, relu, n_rows, n_valid):
        """SAGEConv (mean aggregation): mean_agg(x)@W_nei + x@W_root + b (+ReLU)."""
        deg = jnp.sum(adj.astype(f32), axis=1, keepdims=True)          # exact integer counts
        inv_deg = 1.0 / jnp.maximum(deg, 1.0)                          # exact divide ([R,1], cheap)
        agg = jnp.dot(adj, x.astype(bf16), preferred_element_type=f32) * inv_deg
        out = (jnp.dot(agg.astype(bf16), wn_ref[layer], preferred_element_type=f32)
               + jnp.dot(x.astype(bf16), wr_ref[layer], preferred_element_type=f32)
               + b_ref[layer])
        if relu:
            out = jnp.maximum(out, 0.0)
        row = lax.broadcasted_iota(jnp.int32, (n_rows, cp), 0)
        return jnp.where(row < n_valid, out, 0.0)   # keep padded / inactive rows exactly zero

    def pool(x, adj, n_rows, n_valid):
        """Parameter-free fixed-k TopK pool via 0/1 selection matmuls (bf16 MXU)."""
        ii = lax.broadcasted_iota(jnp.int32, (n_rows, n_rows), 0)      # row (sublane) index
        jj = lax.broadcasted_iota(jnp.int32, (n_rows, n_rows), 1)      # col (lane) index
        s_col = jnp.sqrt(jnp.sum(x * x, axis=1, keepdims=True) + 1e-12)          # [R,1] scores
        # exact transpose of the score vector via identity mask + sublane reduce
        s_row = jnp.sum(jnp.where(ii == jj, s_col, 0.0), axis=0, keepdims=True)  # [1,R]
        # beats[i,j]: VALID node i outranks node j (descending score, stable index tiebreak).
        # Masking the beater to i < n_valid keeps padded rows out of the competition.
        beats = (ii < n_valid) & ((s_col > s_row) | ((s_col == s_row) & (ii < jj)))
        rank_row = jnp.sum(beats.astype(f32), axis=0, keepdims=True)   # [1,R] rank of node j
        # rank_col is just rank_row transposed (same quantity) -> identity-mask lane reduce,
        # no second (N,N) compare matrix.
        rank_col = jnp.sum(jnp.where(ii == jj, rank_row, 0.0), axis=1, keepdims=True)  # [R,1]

        slot_r = lax.broadcasted_iota(jnp.int32, (kpad, n_rows), 0)
        node_c = lax.broadcasted_iota(jnp.int32, (kpad, n_rows), 1)
        sel = jnp.where((rank_row == slot_r.astype(f32)) & (slot_r < k) & (node_c < n_valid),
                        1.0, 0.0).astype(bf16)                         # S   [slot, node]
        node_r = lax.broadcasted_iota(jnp.int32, (n_rows, kpad), 0)
        slot_c = lax.broadcasted_iota(jnp.int32, (n_rows, kpad), 1)
        sel_t = jnp.where((rank_col == slot_c.astype(f32)) & (slot_c < k) & (node_r < n_valid),
                          1.0, 0.0).astype(bf16)                       # S^T [node, slot]

        gate = jnp.tanh(s_col)
        x_pool = jnp.dot(sel, (x * gate).astype(bf16), preferred_element_type=f32)   # [kpad, CP]
        adj_pool = jnp.dot(jnp.dot(sel, adj, preferred_element_type=f32).astype(bf16),
                           sel_t, preferred_element_type=f32).astype(bf16)           # [kpad, kpad]
        return x_pool, adj_pool, sel_t

    adj0 = adj_ref[...]                       # bf16 [npad, npad], exactly 0/1
    x = x_ref[...]                            # f32  [npad, 128]
    adj = adj0
    n_rows, n_valid = npad, n0
    sel_t0 = None
    # ---- down path: pool -> conv -> relu (working set shrinks to kpad rows) ----
    for i in range(depth):
        x_p, adj_p, s_t = pool(x, adj, n_rows, n_valid)
        if i == 0:
            sel_t0 = s_t                      # only the level-0 unpool is ever consumed
        x = sage(adj_p, x_p, layer=i, relu=True, n_rows=kpad, n_valid=k)
        adj = adj_p
        n_rows, n_valid = kpad, k
    # TODO(synk): the reference's compute_loss=True branch (L_FP / L_similarity /
    # L_regularization) mixes tensors with incompatible shapes; only the
    # compute_loss=False path is reproduced here.

    # ---- up path + final conv --------------------------------------------------
    # The reference overwrites x from xs[-1] at every up iteration, so only i == 0
    # reaches final_conv; the i > 0 iterations are dead compute and are skipped
    # (identical output).
    h = jnp.dot(sel_t0, x.astype(bf16), preferred_element_type=f32)    # unpool = S0^T @ x_deep
    h = sage(adj0, h, layer=depth, relu=True, n_rows=npad, n_valid=n0)
    o_ref[...] = sage(adj0, h, layer=2 * depth - 1, relu=False, n_rows=npad, n_valid=n0)


# ----------------------------------------------------------------------------
# Wrapper: padding, parameter stacking, pallas_call.
# ----------------------------------------------------------------------------
def graph_unet_forward(params, x, edge_index, depth, k):
    """GraphUNet forward (compute_loss=False path) as one fused Pallas kernel."""
    assert depth >= 2
    convs, final = params
    n0, in_ch = x.shape
    out_ch = final[0].shape[1]
    assert 1 <= k <= n0
    npad = _round_up(n0, ROW_PAD)
    kpad = _round_up(k, ROW_PAD)
    layers = list(convs) + [final]
    num_layers = len(layers)                      # == 2 * depth
    assert num_layers == 2 * depth
    assert max(in_ch, out_ch, max(w.shape[1] for (w, _, _) in layers)) <= LANES

    # Stack + zero-pad parameters into lane-dense slabs (bf16 MXU operands, f32 bias).
    w_nei = jnp.stack([_pad2d(w, LANES, LANES) for (w, _, _) in layers]).astype(jnp.bfloat16)
    w_root = jnp.stack([_pad2d(w, LANES, LANES) for (_, w, _) in layers]).astype(jnp.bfloat16)
    bias = jnp.stack([_pad2d(b.reshape(1, -1), 1, LANES) for (_, _, b) in layers])  # [L,1,128] f32

    x_pad = _pad2d(x.astype(jnp.float32), npad, LANES)
    src, dst = edge_index[0], edge_index[1]
    # bf16 adjacency (exactly 0/1): halves the dominant HBM->VMEM transfer.
    adj = jnp.zeros((npad, npad), jnp.bfloat16).at[dst, src].set(1.0)  # A[i,j]=1 iff edge j->i

    # VMEM budget derived from the problem size; capped below the physical ceiling.
    est = (4 * npad * npad * 4            # O(N^2) pooling temporaries (iota/beats/sel) at level 0
           + 2 * npad * npad * 2          # adjacency (bf16) + headroom
           + 12 * npad * LANES * 4        # feature slabs / temporaries
           + 2 * num_layers * LANES * LANES * 2
           + (4 << 20))
    try:
        phys = int(pltpu.get_tpu_info().vmem_capacity_bytes)
    except Exception:
        phys = 64 * 1024 * 1024
    vmem_limit = int(min(max(est, 16 * 1024 * 1024), int(phys * 0.9)))

    mm = lambda m, kk, n: 2 * m * kk * n
    flops = (mm(kpad, npad, npad) + mm(kpad, npad, kpad) + mm(kpad, npad, LANES)     # level-0 pool
             + (depth - 1) * (2 * mm(kpad, kpad, kpad) + mm(kpad, kpad, LANES))      # deeper pools
             + depth * (mm(kpad, kpad, LANES) + 2 * mm(kpad, LANES, LANES))          # down convs
             + mm(npad, kpad, LANES)                                                 # unpool
             + 2 * (mm(npad, npad, LANES) + 2 * mm(npad, LANES, LANES)))             # up + final conv
    bytes_accessed = int(adj.size * 2 + x_pad.size * 4 + w_nei.size * 2
                         + w_root.size * 2 + bias.size * 4 + npad * LANES * 4)
    cost = pl.CostEstimate(flops=int(flops), transcendentals=int(depth * npad),
                           bytes_accessed=bytes_accessed)

    kernel = functools.partial(_graph_unet_kernel, depth=depth, n0=n0, k=k,
                               npad=npad, kpad=kpad)
    vmem = pltpu.MemorySpace.VMEM
    out = pl.pallas_call(
        kernel,
        out_shape=jax.ShapeDtypeStruct((npad, LANES), jnp.float32),
        # No grid, no index_maps: whole-array VMEM residency, no double-buffering.
        in_specs=[pl.BlockSpec(memory_space=vmem) for _ in range(5)],
        out_specs=pl.BlockSpec(memory_space=vmem),
        compiler_params=pltpu.CompilerParams(vmem_limit_bytes=vmem_limit),
        cost_estimate=cost,
    )(adj, x_pad, w_nei, w_root, bias)
    # TODO(synk): graphs whose dense (npad x npad) adjacency does not fit VMEM need a
    # row-tiled, pipelined per-conv variant for the level-0 and final convs instead of
    # this fully fused kernel.
    return out[:n0, :out_ch]


# ----------------------------------------------------------------------------
# Parameter init (deterministic, torch.nn.Linear-style uniform).
# ----------------------------------------------------------------------------
def init_sage(key, cin, cout):
    k1, k2, k3 = jax.random.split(key, 3)
    s = 1.0 / math.sqrt(cin)
    wn = jax.random.uniform(k1, (cin, cout), jnp.float32, -s, s)
    wr = jax.random.uniform(k2, (cin, cout), jnp.float32, -s, s)
    b = jax.random.uniform(k3, (cout,), jnp.float32, -s, s)
    return wn, wr, b


def init_graph_unet(key, in_ch, hid, out_ch, depth):
    keys = jax.random.split(key, 2 * depth)
    convs = []
    for i in range(depth):                       # down convs
        convs.append(init_sage(keys[i], in_ch if i == 0 else hid, hid))
    for i in range(depth - 1):                   # up convs
        convs.append(init_sage(keys[depth + i], hid, hid))
    final = init_sage(keys[2 * depth - 1], hid, out_ch)
    return convs, final


# ----------------------------------------------------------------------------
if __name__ == "__main__":
    key = jax.random.PRNGKey(0)
    n0, in_ch, hid, out_ch = 16, 8, 32, 8
    depth, pool_ratio = 3, 0.5
    k_nodes = max(1, int(math.ceil(pool_ratio * n0)))   # fixed cluster count = 8

    kx, kp = jax.random.split(key, 2)
    x = jax.random.normal(kx, (n0, in_ch), jnp.float32)

    # small deterministic graph: bidirectional ring + chords (64 directed edges)
    idx = jnp.arange(n0, dtype=jnp.int32)
    src = jnp.concatenate([idx, (idx + 1) % n0, idx, (idx + 5) % n0])
    dst = jnp.concatenate([(idx + 1) % n0, idx, (idx + 5) % n0, idx])
    edge_index = jnp.stack([src, dst])                   # [2, 64]

    params = init_graph_unet(kp, in_ch, hid, out_ch, depth)
    fwd = jax.jit(functools.partial(graph_unet_forward, depth=depth, k=k_nodes))
    out = fwd(params, x, edge_index)
    out = jax.block_until_ready(out)
    assert out.shape == (n0, out_ch) and out.dtype == jnp.float32
    print("KERNEL_OK")
</pallas_src>

<mosaic_0001>
module attributes {stable_mosaic.version = 11 : i64} {
  func.func @_graph_unet_kernel(%arg0: memref<16x16xbf16, #tpu.memory_space<vmem>>, %arg1: memref<16x128xf32, #tpu.memory_space<vmem>>, %arg2: memref<6x128x128xbf16, #tpu.memory_space<vmem>>, %arg3: memref<6x128x128xbf16, #tpu.memory_space<vmem>>, %arg4: memref<6x1x128xf32, #tpu.memory_space<vmem>>, %arg5: memref<16x128xf32, #tpu.memory_space<vmem>>) attributes {dimension_semantics = [], scalar_prefetch = 0 : i64, scratch_operands = 0 : i64, tpu.core_type = #tpu.core_type<tc>} {
    %c0 = arith.constant 0 : index
    %c0_0 = arith.constant 0 : index
    %0 = vector.load %arg0[%c0, %c0_0] : memref<16x16xbf16, #tpu.memory_space<vmem>>, vector<16x16xbf16>
    %c0_1 = arith.constant 0 : index
    %c0_2 = arith.constant 0 : index
    %1 = vector.load %arg1[%c0_1, %c0_2] : memref<16x128xf32, #tpu.memory_space<vmem>>, vector<16x128xf32>
    %2 = tpu.iota {dimensions = array<i32: 0>} : vector<16x16xi32>
    %3 = tpu.iota {dimensions = array<i32: 1>} : vector<16x16xi32>
    %4 = arith.mulf %1, %1 : vector<16x128xf32>
    %cst = arith.constant dense<0.000000e+00> : vector<16xf32>
    %5 = vector.multi_reduction <add>, %4, %cst [1] : vector<16x128xf32> to vector<16xf32>
    %6 = vector.shape_cast %5 : vector<16xf32> to vector<16x1xf32>
    %cst_3 = arith.constant 9.99999996E-13 : f32
    %7 = vector.broadcast %cst_3 : f32 to vector<16x1xf32>
    %8 = arith.addf %6, %7 : vector<16x1xf32>
    %9 = math.sqrt %8 : vector<16x1xf32>
    %10 = arith.cmpi eq, %2, %3 : vector<16x16xi32>
    %cst_4 = arith.constant 0.000000e+00 : f32
    %11 = vector.shape_cast %9 : vector<16x1xf32> to vector<16x1xf32>
    %12 = vector.broadcast %11 : vector<16x1xf32> to vector<16x16xf32>
    %13 = vector.broadcast %cst_4 : f32 to vector<16x16xf32>
    %14 = arith.select %10, %12, %13 : vector<16x16xi1>, vector<16x16xf32>
    %cst_5 = arith.constant dense<0.000000e+00> : vector<16xf32>
    %15 = vector.multi_reduction <add>, %14, %cst_5 [0] : vector<16x16xf32> to vector<16xf32>
    %16 = vector.shape_cast %15 : vector<16xf32> to vector<1x16xf32>
    %c16_i32 = arith.constant 16 : i32
    %17 = vector.broadcast %c16_i32 : i32 to vector<16x16xi32>
    %18 = arith.cmpi slt, %2, %17 : vector<16x16xi32>
    %19 = vector.broadcast %9 : vector<16x1xf32> to vector<16x16xf32>
    %20 = vector.broadcast %16 : vector<1x16xf32> to vector<16x16xf32>
    %21 = arith.cmpf ogt, %19, %20 : vector<16x16xf32>
    %22 = vector.broadcast %9 : vector<16x1xf32> to vector<16x16xf32>
    %23 = vector.broadcast %16 : vector<1x16xf32> to vector<16x16xf32>
    %24 = arith.cmpf oeq, %22, %23 : vector<16x16xf32>
    %25 = arith.cmpi slt, %2, %3 : vector<16x16xi32>
    %26 = arith.andi %24, %25 : vector<16x16xi1>
    %27 = arith.ori %21, %26 : vector<16x16xi1>
    %28 = arith.andi %18, %27 : vector<16x16xi1>
    %29 = arith.extui %28 : vector<16x16xi1> to vector<16x16xi32>
    %30 = arith.sitofp %29 : vector<16x16xi32> to vector<16x16xf32>
    %cst_6 = arith.constant dense<0.000000e+00> : vector<16xf32>
    %31 = vector.multi_reduction <add>, %30, %cst_6 [0] : vector<16x16xf32> to vector<16xf32>
    %32 = vector.shape_cast %31 : vector<16xf32> to vector<1x16xf32>
    %33 = arith.cmpi eq, %2, %3 : vector<16x16xi32>
    %cst_7 = arith.constant 0.000000e+00 : f32
    %34 = vector.shape_cast %32 : vector<1x16xf32> to vector<1x16xf32>
    %35 = vector.broadcast %34 : vector<1x16xf32> to vector<16x16xf32>
    %36 = vector.broadcast %cst_7 : f32 to vector<16x16xf32>
    %37 = arith.select %33, %35, %36 : vector<16x16xi1>, vector<16x16xf32>
    %cst_8 = arith.constant dense<0.000000e+00> : vector<16xf32>
    %38 = vector.multi_reduction <add>, %37, %cst_8 [1] : vector<16x16xf32> to vector<16xf32>
    %39 = vector.shape_cast %38 : vector<16xf32> to vector<16x1xf32>
    %40 = tpu.iota {dimensions = array<i32: 0>} : vector<16x16xi32>
    %41 = tpu.iota {dimensions = array<i32: 1>} : vector<16x16xi32>
    %42 = arith.sitofp %40 : vector<16x16xi32> to vector<16x16xf32>
    %43 = vector.broadcast %32 : vector<1x16xf32> to vector<16x16xf32>
    %44 = arith.cmpf oeq, %43, %42 : vector<16x16xf32>
    %c8_i32 = arith.constant 8 : i32
    %45 = vector.broadcast %c8_i32 : i32 to vector<16x16xi32>
    %46 = arith.cmpi slt, %40, %45 : vector<16x16xi32>
    %47 = arith.andi %44, %46 : vector<16x16xi1>
    %c16_i32_9 = arith.constant 16 : i32
    %48 = vector.broadcast %c16_i32_9 : i32 to vector<16x16xi32>
    %49 = arith.cmpi slt, %41, %48 : vector<16x16xi32>
    %50 = arith.andi %47, %49 : vector<16x16xi1>
    %cst_10 = arith.constant 1.000000e+00 : f32
    %cst_11 = arith.constant 0.000000e+00 : f32
    %51 = vector.broadcast %cst_10 : f32 to vector<16x16xf32>
    %52 = vector.broadcast %cst_11 : f32 to vector<16x16xf32>
    %53 = arith.select %50, %51, %52 : vector<16x16xi1>, vector<16x16xf32>
    %54 = arith.truncf %53 : vector<16x16xf32> to vector<16x16xbf16>
    %55 = tpu.iota {dimensions = array<i32: 0>} : vector<16x16xi32>
    %56 = tpu.iota {dimensions = array<i32: 1>} : vector<16x16xi32>
    %57 = arith.sitofp %56 : vector<16x16xi32> to vector<16x16xf32>
    %58 = vector.broadcast %39 : vector<16x1xf32> to vector<16x16xf32>
    %59 = arith.cmpf oeq, %58, %57 : vector<16x16xf32>
    %c8_i32_12 = arith.constant 8 : i32
    %60 = vector.broadcast %c8_i32_12 : i32 to vector<16x16xi32>
    %61 = arith.cmpi slt, %56, %60 : vector<16x16xi32>
    %62 = arith.andi %59, %61 : vector<16x16xi1>
    %c16_i32_13 = arith.constant 16 : i32
    %63 = vector.broadcast %c16_i32_13 : i32 to vector<16x16xi32>
    %64 = arith.cmpi slt, %55, %63 : vector<16x16xi32>
    %65 = arith.andi %62, %64 : vector<16x16xi1>
    %cst_14 = arith.constant 1.000000e+00 : f32
    %cst_15 = arith.constant 0.000000e+00 : f32
    %66 = vector.broadcast %cst_14 : f32 to vector<16x16xf32>
    %67 = vector.broadcast %cst_15 : f32 to vector<16x16xf32>
    %68 = arith.select %65, %66, %67 : vector<16x16xi1>, vector<16x16xf32>
    %69 = arith.truncf %68 : vector<16x16xf32> to vector<16x16xbf16>
    %70 = math.tanh %9 : vector<16x1xf32>
    %71 = vector.broadcast %70 : vector<16x1xf32> to vector<16x128xf32>
    %72 = arith.mulf %1, %71 : vector<16x128xf32>
    %73 = arith.truncf %72 : vector<16x128xf32> to vector<16x128xbf16>
    %cst_16 = arith.constant dense<0.000000e+00> : vector<16x128xf32>
    %74 = tpu.matmul %54, %73, %cst_16 {dimension_numbers = #tpu.dot_dimension_numbers<[1], [0], [0], [1], [0, 0, 1, 1], [], []>} : vector<16x16xbf16>, vector<16x128xbf16>, vector<16x128xf32> -> vector<16x128xf32>
    %cst_17 = arith.constant dense<0.000000e+00> : vector<16x16xf32>
    %75 = tpu.matmul %54, %0, %cst_17 {dimension_numbers = #tpu.dot_dimension_numbers<[1], [0], [0], [1], [0, 0, 1, 1], [], []>} : vector<16x16xbf16>, vector<16x16xbf16>, vector<16x16xf32> -> vector<16x16xf32>
    %76 = arith.truncf %75 : vector<16x16xf32> to vector<16x16xbf16>
    %cst_18 = arith.constant dense<0.000000e+00> : vector<16x16xf32>
    %77 = tpu.matmul %76, %69, %cst_18 {dimension_numbers = #tpu.dot_dimension_numbers<[1], [0], [0], [1], [0, 0, 1, 1], [], []>} : vector<16x16xbf16>, vector<16x16xbf16>, vector<16x16xf32> -> vector<16x16xf32>
    %78 = arith.truncf %77 : vector<16x16xf32> to vector<16x16xbf16>
    %79 = arith.extf %78 : vector<16x16xbf16> to vector<16x16xf32>
    %cst_19 = arith.constant dense<0.000000e+00> : vector<16xf32>
    %80 = vector.multi_reduction <add>, %79, %cst_19 [1] : vector<16x16xf32> to vector<16xf32>
    %81 = vector.shape_cast %80 : vector<16xf32> to vector<16x1xf32>
    %cst_20 = arith.constant 1.000000e+00 : f32
    %82 = vector.broadcast %cst_20 : f32 to vector<16x1xf32>
    %83 = arith.maximumf %81, %82 : vector<16x1xf32>
    %cst_21 = arith.constant 1.000000e+00 : f32
    %84 = vector.broadcast %cst_21 : f32 to vector<16x1xf32>
    %85 = arith.divf %84, %83 : vector<16x1xf32>
    %86 = arith.truncf %74 : vector<16x128xf32> to vector<16x128xbf16>
    %cst_22 = arith.constant dense<0.000000e+00> : vector<16x128xf32>
    %87 = tpu.matmul %78, %86, %cst_22 {dimension_numbers = #tpu.dot_dimension_numbers<[1], [0], [0], [1], [0, 0, 1, 1], [], []>} : vector<16x16xbf16>, vector<16x128xbf16>, vector<16x128xf32> -> vector<16x128xf32>
    %88 = vector.broadcast %85 : vector<16x1xf32> to vector<16x128xf32>
    %89 = arith.mulf %87, %88 : vector<16x128xf32>
    %90 = arith.truncf %89 : vector<16x128xf32> to vector<16x128xbf16>
    %c0_23 = arith.constant 0 : index
    %c0_24 = arith.constant 0 : index
    %c0_25 = arith.constant 0 : index
    %91 = vector.load %arg2[%c0_23, %c0_24, %c0_25] : memref<6x128x128xbf16, #tpu.memory_space<vmem>>, vector<1x128x128xbf16>
    %92 = vector.shape_cast %91 : vector<1x128x128xbf16> to vector<128x128xbf16>
    %cst_26 = arith.constant dense<0.000000e+00> : vector<16x128xf32>
    %93 = tpu.matmul %90, %92, %cst_26 {dimension_numbers = #tpu.dot_dimension_numbers<[1], [0], [0], [1], [0, 0, 1, 1], [], []>} : vector<16x128xbf16>, vector<128x128xbf16>, vector<16x128xf32> -> vector<16x128xf32>
    %94 = arith.truncf %74 : vector<16x128xf32> to vector<16x128xbf16>
    %c0_27 = arith.constant 0 : index
    %c0_28 = arith.constant 0 : index
    %c0_29 = arith.constant 0 : index
    %95 = vector.load %arg3[%c0_27, %c0_28, %c0_29] : memref<6x128x128xbf16, #tpu.memory_space<vmem>>, vector<1x128x128xbf16>
    %96 = vector.shape_cast %95 : vector<1x128x128xbf16> to vector<128x128xbf16>
    %cst_30 = arith.constant dense<0.000000e+00> : vector<16x128xf32>
    %97 = tpu.matmul %94, %96, %cst_30 {dimension_numbers = #tpu.dot_dimension_numbers<[1], [0], [0], [1], [0, 0, 1, 1], [], []>} : vector<16x128xbf16>, vector<128x128xbf16>, vector<16x128xf32> -> vector<16x128xf32>
    %98 = arith.addf %93, %97 : vector<16x128xf32>
    %c0_31 = arith.constant 0 : index
    %c0_32 = arith.constant 0 : index
    %c0_33 = arith.constant 0 : index
    %99 = vector.load %arg4[%c0_31, %c0_32, %c0_33] : memref<6x1x128xf32, #tpu.memory_space<vmem>>, vector<1x1x128xf32>
    %100 = vector.shape_cast %99 : vector<1x1x128xf32> to vector<1x128xf32>
    %101 = vector.broadcast %100 : vector<1x128xf32> to vector<16x128xf32>
    %102 = arith.addf %98, %101 : vector<16x128xf32>
    %cst_34 = arith.constant 0.000000e+00 : f32
    %103 = vector.broadcast %cst_34 : f32 to vector<16x128xf32>
    %104 = arith.maximumf %102, %103 : vector<16x128xf32>
    %105 = tpu.iota {dimensions = array<i32: 0>} : vector<16x128xi32>
    %c8_i32_35 = arith.constant 8 : i32
    %106 = vector.broadcast %c8_i32_35 : i32 to vector<16x128xi32>
    %107 = arith.cmpi slt, %105, %106 : vector<16x128xi32>
    %cst_36 = arith.constant 0.000000e+00 : f32
    %108 = vector.broadcast %cst_36 : f32 to vector<16x128xf32>
    %109 = arith.select %107, %104, %108 : vector<16x128xi1>, vector<16x128xf32>
    %110 = tpu.iota {dimensions = array<i32: 0>} : vector<16x16xi32>
    %111 = tpu.iota {dimensions = array<i32: 1>} : vector<16x16xi32>
    %112 = arith.mulf %109, %109 : vector<16x128xf32>
    %cst_37 = arith.constant dense<0.000000e+00> : vector<16xf32>
    %113 = vector.multi_reduction <add>, %112, %cst_37 [1] : vector<16x128xf32> to vector<16xf32>
    %114 = vector.shape_cast %113 : vector<16xf32> to vector<16x1xf32>
    %cst_38 = arith.constant 9.99999996E-13 : f32
    %115 = vector.broadcast %cst_38 : f32 to vector<16x1xf32>
    %116 = arith.addf %114, %115 : vector<16x1xf32>
    %117 = math.sqrt %116 : vector<16x1xf32>
    %118 = arith.cmpi eq, %110, %111 : vector<16x16xi32>
    %cst_39 = arith.constant 0.000000e+00 : f32
    %119 = vector.shape_cast %117 : vector<16x1xf32> to vector<16x1xf32>
    %120 = vector.broadcast %119 : vector<16x1xf32> to vector<16x16xf32>
    %121 = vector.broadcast %cst_39 : f32 to vector<16x16xf32>
    %122 = arith.select %118, %120, %121 : vector<16x16xi1>, vector<16x16xf32>
    %cst_40 = arith.constant dense<0.000000e+00> : vector<16xf32>
    %123 = vector.multi_reduction <add>, %122, %cst_40 [0] : vector<16x16xf32> to vector<16xf32>
    %124 = vector.shape_cast %123 : vector<16xf32> to vector<1x16xf32>
    %c8_i32_41 = arith.constant 8 : i32
    %125 = vector.broadcast %c8_i32_41 : i32 to vector<16x16xi32>
    %126 = arith.cmpi slt, %110, %125 : vector<16x16xi32>
    %127 = vector.broadcast %117 : vector<16x1xf32> to vector<16x16xf32>
    %128 = vector.broadcast %124 : vector<1x16xf32> to vector<16x16xf32>
    %129 = arith.cmpf ogt, %127, %128 : vector<16x16xf32>
    %130 = vector.broadcast %117 : vector<16x1xf32> to vector<16x16xf32>
    %131 = vector.broadcast %124 : vector<1x16xf32> to vector<16x16xf32>
    %132 = arith.cmpf oeq, %130, %131 : vector<16x16xf32>
    %133 = arith.cmpi slt, %110, %111 : vector<16x16xi32>
    %134 = arith.andi %132, %133 : vector<16x16xi1>
    %135 = arith.ori %129, %134 : vector<16x16xi1>
    %136 = arith.andi %126, %135 : vector<16x16xi1>
    %137 = arith.extui %136 : vector<16x16xi1> to vector<16x16xi32>
    %138 = arith.sitofp %137 : vector<16x16xi32> to vector<16x16xf32>
    %cst_42 = arith.constant dense<0.000000e+00> : vector<16xf32>
    %139 = vector.multi_reduction <add>, %138, %cst_42 [0] : vector<16x16xf32> to vector<16xf32>
    %140 = vector.shape_cast %139 : vector<16xf32> to vector<1x16xf32>
    %141 = arith.cmpi eq, %110, %111 : vector<16x16xi32>
    %cst_43 = arith.constant 0.000000e+00 : f32
    %142 = vector.shape_cast %140 : vector<1x16xf32> to vector<1x16xf32>
    %143 = vector.broadcast %142 : vector<1x16xf32> to vector<16x16xf32>
    %144 = vector.broadcast %cst_43 : f32 to vector<16x16xf32>
    %145 = arith.select %141, %143, %144 : vector<16x16xi1>, vector<16x16xf32>
    %cst_44 = arith.constant dense<0.000000e+00> : vector<16xf32>
    %146 = vector.multi_reduction <add>, %145, %cst_44 [1] : vector<16x16xf32> to vector<16xf32>
    %147 = vector.shape_cast %146 : vector<16xf32> to vector<16x1xf32>
    %148 = tpu.iota {dimensions = array<i32: 0>} : vector<16x16xi32>
    %149 = tpu.iota {dimensions = array<i32: 1>} : vector<16x16xi32>
    %150 = arith.sitofp %148 : vector<16x16xi32> to vector<16x16xf32>
    %151 = vector.broadcast %140 : vector<1x16xf32> to vector<16x16xf32>
    %152 = arith.cmpf oeq, %151, %150 : vector<16x16xf32>
    %c8_i32_45 = arith.constant 8 : i32
    %153 = vector.broadcast %c8_i32_45 : i32 to vector<16x16xi32>
    %154 = arith.cmpi slt, %148, %153 : vector<16x16xi32>
    %155 = arith.andi %152, %154 : vector<16x16xi1>
    %c8_i32_46 = arith.constant 8 : i32
    %156 = vector.broadcast %c8_i32_46 : i32 to vector<16x16xi32>
    %157 = arith.cmpi slt, %149, %156 : vector<16x16xi32>
    %158 = arith.andi %155, %157 : vector<16x16xi1>
    %cst_47 = arith.constant 1.000000e+00 : f32
    %cst_48 = arith.constant 0.000000e+00 : f32
    %159 = vector.broadcast %cst_47 : f32 to vector<16x16xf32>
    %160 = vector.broadcast %cst_48 : f32 to vector<16x16xf32>
    %161 = arith.select %158, %159, %160 : vector<16x16xi1>, vector<16x16xf32>
    %162 = arith.truncf %161 : vector<16x16xf32> to vector<16x16xbf16>
    %163 = tpu.iota {dimensions = array<i32: 0>} : vector<16x16xi32>
    %164 = tpu.iota {dimensions = array<i32: 1>} : vector<16x16xi32>
    %165 = arith.sitofp %164 : vector<16x16xi32> to vector<16x16xf32>
    %166 = vector.broadcast %147 : vector<16x1xf32> to vector<16x16xf32>
    %167 = arith.cmpf oeq, %166, %165 : vector<16x16xf32>
    %c8_i32_49 = arith.constant 8 : i32
    %168 = vector.broadcast %c8_i32_49 : i32 to vector<16x16xi32>
    %169 = arith.cmpi slt, %164, %168 : vector<16x16xi32>
    %170 = arith.andi %167, %169 : vector<16x16xi1>
    %c8_i32_50 = arith.constant 8 : i32
    %171 = vector.broadcast %c8_i32_50 : i32 to vector<16x16xi32>
    %172 = arith.cmpi slt, %163, %171 : vector<16x16xi32>
    %173 = arith.andi %170, %172 : vector<16x16xi1>
    %cst_51 = arith.constant 1.000000e+00 : f32
    %cst_52 = arith.constant 0.000000e+00 : f32
    %174 = vector.broadcast %cst_51 : f32 to vector<16x16xf32>
    %175 = vector.broadcast %cst_52 : f32 to vector<16x16xf32>
    %176 = arith.select %173, %174, %175 : vector<16x16xi1>, vector<16x16xf32>
    %177 = arith.truncf %176 : vector<16x16xf32> to vector<16x16xbf16>
    %178 = math.tanh %117 : vector<16x1xf32>
    %179 = vector.broadcast %178 : vector<16x1xf32> to vector<16x128xf32>
    %180 = arith.mulf %109, %179 : vector<16x128xf32>
    %181 = arith.truncf %180 : vector<16x128xf32> to vector<16x128xbf16>
    %cst_53 = arith.constant dense<0.000000e+00> : vector<16x128xf32>
    %182 = tpu.matmul %162, %181, %cst_53 {dimension_numbers = #tpu.dot_dimension_numbers<[1], [0], [0], [1], [0, 0, 1, 1], [], []>} : vector<16x16xbf16>, vector<16x128xbf16>, vector<16x128xf32> -> vector<16x128xf32>
    %cst_54 = arith.constant dense<0.000000e+00> : vector<16x16xf32>
    %183 = tpu.matmul %162, %78, %cst_54 {dimension_numbers = #tpu.dot_dimension_numbers<[1], [0], [0], [1], [0, 0, 1, 1], [], []>} : vector<16x16xbf16>, vector<16x16xbf16>, vector<16x16xf32> -> vector<16x16xf32>
    %184 = arith.truncf %183 : vector<16x16xf32> to vector<16x16xbf16>
    %cst_55 = arith.constant dense<0.000000e+00> : vector<16x16xf32>
    %185 = tpu.matmul %184, %177, %cst_55 {dimension_numbers = #tpu.dot_dimension_numbers<[1], [0], [0], [1], [0, 0, 1, 1], [], []>} : vector<16x16xbf16>, vector<16x16xbf16>, vector<16x16xf32> -> vector<16x16xf32>
    %186 = arith.truncf %185 : vector<16x16xf32> to vector<16x16xbf16>
    %187 = arith.extf %186 : vector<16x16xbf16> to vector<16x16xf32>
    %cst_56 = arith.constant dense<0.000000e+00> : vector<16xf32>
    %188 = vector.multi_reduction <add>, %187, %cst_56 [1] : vector<16x16xf32> to vector<16xf32>
    %189 = vector.shape_cast %188 : vector<16xf32> to vector<16x1xf32>
    %cst_57 = arith.constant 1.000000e+00 : f32
    %190 = vector.broadcast %cst_57 : f32 to vector<16x1xf32>
    %191 = arith.maximumf %189, %190 : vector<16x1xf32>
    %cst_58 = arith.constant 1.000000e+00 : f32
    %192 = vector.broadcast %cst_58 : f32 to vector<16x1xf32>
    %193 = arith.divf %192, %191 : vector<16x1xf32>
    %194 = arith.truncf %182 : vector<16x128xf32> to vector<16x128xbf16>
    %cst_59 = arith.constant dense<0.000000e+00> : vector<16x128xf32>
    %195 = tpu.matmul %186, %194, %cst_59 {dimension_numbers = #tpu.dot_dimension_numbers<[1], [0], [0], [1], [0, 0, 1, 1], [], []>} : vector<16x16xbf16>, vector<16x128xbf16>, vector<16x128xf32> -> vector<16x128xf32>
    %196 = vector.broadcast %193 : vector<16x1xf32> to vector<16x128xf32>
    %197 = arith.mulf %195, %196 : vector<16x128xf32>
    %198 = arith.truncf %197 : vector<16x128xf32> to vector<16x128xbf16>
    %c1 = arith.constant 1 : index
    %c0_60 = arith.constant 0 : index
    %c0_61 = arith.constant 0 : index
    %199 = vector.load %arg2[%c1, %c0_60, %c0_61] : memref<6x128x128xbf16, #tpu.memory_space<vmem>>, vector<1x128x128xbf16>
    %200 = vector.shape_cast %199 : vector<1x128x128xbf16> to vector<128x128xbf16>
    %cst_62 = arith.constant dense<0.000000e+00> : vector<16x128xf32>
    %201 = tpu.matmul %198, %200, %cst_62 {dimension_numbers = #tpu.dot_dimension_numbers<[1], [0], [0], [1], [0, 0, 1, 1], [], []>} : vector<16x128xbf16>, vector<128x128xbf16>, vector<16x128xf32> -> vector<16x128xf32>
    %202 = arith.truncf %182 : vector<16x128xf32> to vector<16x128xbf16>
    %c1_63 = arith.constant 1 : index
    %c0_64 = arith.constant 0 : index
    %c0_65 = arith.constant 0 : index
    %203 = vector.load %arg3[%c1_63, %c0_64, %c0_65] : memref<6x128x128xbf16, #tpu.memory_space<vmem>>, vector<1x128x128xbf16>
    %204 = vector.shape_cast %203 : vector<1x128x128xbf16> to vector<128x128xbf16>
    %cst_66 = arith.constant dense<0.000000e+00> : vector<16x128xf32>
    %205 = tpu.matmul %202, %204, %cst_66 {dimension_numbers = #tpu.dot_dimension_numbers<[1], [0], [0], [1], [0, 0, 1, 1], [], []>} : vector<16x128xbf16>, vector<128x128xbf16>, vector<16x128xf32> -> vector<16x128xf32>
    %206 = arith.addf %201, %205 : vector<16x128xf32>
    %c1_67 = arith.constant 1 : index
    %c0_68 = arith.constant 0 : index
    %c0_69 = arith.constant 0 : index
    %207 = vector.load %arg4[%c1_67, %c0_68, %c0_69] : memref<6x1x128xf32, #tpu.memory_space<vmem>>, vector<1x1x128xf32>
    %208 = vector.shape_cast %207 : vector<1x1x128xf32> to vector<1x128xf32>
    %209 = vector.broadcast %208 : vector<1x128xf32> to vector<16x128xf32>
    %210 = arith.addf %206, %209 : vector<16x128xf32>
    %cst_70 = arith.constant 0.000000e+00 : f32
    %211 = vector.broadcast %cst_70 : f32 to vector<16x128xf32>
    %212 = arith.maximumf %210, %211 : vector<16x128xf32>
    %213 = tpu.iota {dimensions = array<i32: 0>} : vector<16x128xi32>
    %c8_i32_71 = arith.constant 8 : i32
    %214 = vector.broadcast %c8_i32_71 : i32 to vector<16x128xi32>
    %215 = arith.cmpi slt, %213, %214 : vector<16x128xi32>
    %cst_72 = arith.constant 0.000000e+00 : f32
    %216 = vector.broadcast %cst_72 : f32 to vector<16x128xf32>
    %217 = arith.select %215, %212, %216 : vector<16x128xi1>, vector<16x128xf32>
    %218 = tpu.iota {dimensions = array<i32: 0>} : vector<16x16xi32>
    %219 = tpu.iota {dimensions = array<i32: 1>} : vector<16x16xi32>
    %220 = arith.mulf %217, %217 : vector<16x128xf32>
    %cst_73 = arith.constant dense<0.000000e+00> : vector<16xf32>
    %221 = vector.multi_reduction <add>, %220, %cst_73 [1] : vector<16x128xf32> to vector<16xf32>
    %222 = vector.shape_cast %221 : vector<16xf32> to vector<16x1xf32>
    %cst_74 = arith.constant 9.99999996E-13 : f32
    %223 = vector.broadcast %cst_74 : f32 to vector<16x1xf32>
    %224 = arith.addf %222, %223 : vector<16x1xf32>
    %225 = math.sqrt %224 : vector<16x1xf32>
    %226 = arith.cmpi eq, %218, %219 : vector<16x16xi32>
    %cst_75 = arith.constant 0.000000e+00 : f32
    %227 = vector.shape_cast %225 : vector<16x1xf32> to vector<16x1xf32>
    %228 = vector.broadcast %227 : vector<16x1xf32> to vector<16x16xf32>
    %229 = vector.broadcast %cst_75 : f32 to vector<16x16xf32>
    %230 = arith.select %226, %228, %229 : vector<16x16xi1>, vector<16x16xf32>
    %cst_76 = arith.constant dense<0.000000e+00> : vector<16xf32>
    %231 = vector.multi_reduction <add>, %230, %cst_76 [0] : vector<16x16xf32> to vector<16xf32>
    %232 = vector.shape_cast %231 : vector<16xf32> to vector<1x16xf32>
    %c8_i32_77 = arith.constant 8 : i32
    %233 = vector.broadcast %c8_i32_77 : i32 to vector<16x16xi32>
    %234 = arith.cmpi slt, %218, %233 : vector<16x16xi32>
    %235 = vector.broadcast %225 : vector<16x1xf32> to vector<16x16xf32>
    %236 = vector.broadcast %232 : vector<1x16xf32> to vector<16x16xf32>
    %237 = arith.cmpf ogt, %235, %236 : vector<16x16xf32>
    %238 = vector.broadcast %225 : vector<16x1xf32> to vector<16x16xf32>
    %239 = vector.broadcast %232 : vector<1x16xf32> to vector<16x16xf32>
    %240 = arith.cmpf oeq, %238, %239 : vector<16x16xf32>
    %241 = arith.cmpi slt, %218, %219 : vector<16x16xi32>
    %242 = arith.andi %240, %241 : vector<16x16xi1>
    %243 = arith.ori %237, %242 : vector<16x16xi1>
    %244 = arith.andi %234, %243 : vector<16x16xi1>
    %245 = arith.extui %244 : vector<16x16xi1> to vector<16x16xi32>
    %246 = arith.sitofp %245 : vector<16x16xi32> to vector<16x16xf32>
    %cst_78 = arith.constant dense<0.000000e+00> : vector<16xf32>
    %247 = vector.multi_reduction <add>, %246, %cst_78 [0] : vector<16x16xf32> to vector<16xf32>
    %248 = vector.shape_cast %247 : vector<16xf32> to vector<1x16xf32>
    %249 = arith.cmpi eq, %218, %219 : vector<16x16xi32>
    %cst_79 = arith.constant 0.000000e+00 : f32
    %250 = vector.shape_cast %248 : vector<1x16xf32> to vector<1x16xf32>
    %251 = vector.broadcast %250 : vector<1x16xf32> to vector<16x16xf32>
    %252 = vector.broadcast %cst_79 : f32 to vector<16x16xf32>
    %253 = arith.select %249, %251, %252 : vector<16x16xi1>, vector<16x16xf32>
    %cst_80 = arith.constant dense<0.000000e+00> : vector<16xf32>
    %254 = vector.multi_reduction <add>, %253, %cst_80 [1] : vector<16x16xf32> to vector<16xf32>
    %255 = vector.shape_cast %254 : vector<16xf32> to vector<16x1xf32>
    %256 = tpu.iota {dimensions = array<i32: 0>} : vector<16x16xi32>
    %257 = tpu.iota {dimensions = array<i32: 1>} : vector<16x16xi32>
    %258 = arith.sitofp %256 : vector<16x16xi32> to vector<16x16xf32>
    %259 = vector.broadcast %248 : vector<1x16xf32> to vector<16x16xf32>
    %260 = arith.cmpf oeq, %259, %258 : vector<16x16xf32>
    %c8_i32_81 = arith.constant 8 : i32
    %261 = vector.broadcast %c8_i32_81 : i32 to vector<16x16xi32>
    %262 = arith.cmpi slt, %256, %261 : vector<16x16xi32>
    %263 = arith.andi %260, %262 : vector<16x16xi1>
    %c8_i32_82 = arith.constant 8 : i32
    %264 = vector.broadcast %c8_i32_82 : i32 to vector<16x16xi32>
    %265 = arith.cmpi slt, %257, %264 : vector<16x16xi32>
    %266 = arith.andi %263, %265 : vector<16x16xi1>
    %cst_83 = arith.constant 1.000000e+00 : f32
    %cst_84 = arith.constant 0.000000e+00 : f32
    %267 = vector.broadcast %cst_83 : f32 to vector<16x16xf32>
    %268 = vector.broadcast %cst_84 : f32 to vector<16x16xf32>
    %269 = arith.select %266, %267, %268 : vector<16x16xi1>, vector<16x16xf32>
    %270 = arith.truncf %269 : vector<16x16xf32> to vector<16x16xbf16>
    %271 = tpu.iota {dimensions = array<i32: 0>} : vector<16x16xi32>
    %272 = tpu.iota {dimensions = array<i32: 1>} : vector<16x16xi32>
    %273 = arith.sitofp %272 : vector<16x16xi32> to vector<16x16xf32>
    %274 = vector.broadcast %255 : vector<16x1xf32> to vector<16x16xf32>
    %275 = arith.cmpf oeq, %274, %273 : vector<16x16xf32>
    %c8_i32_85 = arith.constant 8 : i32
    %276 = vector.broadcast %c8_i32_85 : i32 to vector<16x16xi32>
    %277 = arith.cmpi slt, %272, %276 : vector<16x16xi32>
    %278 = arith.andi %275, %277 : vector<16x16xi1>
    %c8_i32_86 = arith.constant 8 : i32
    %279 = vector.broadcast %c8_i32_86 : i32 to vector<16x16xi32>
    %280 = arith.cmpi slt, %271, %279 : vector<16x16xi32>
    %281 = arith.andi %278, %280 : vector<16x16xi1>
    %cst_87 = arith.constant 1.000000e+00 : f32
    %cst_88 = arith.constant 0.000000e+00 : f32
    %282 = vector.broadcast %cst_87 : f32 to vector<16x16xf32>
    %283 = vector.broadcast %cst_88 : f32 to vector<16x16xf32>
    %284 = arith.select %281, %282, %283 : vector<16x16xi1>, vector<16x16xf32>
    %285 = arith.truncf %284 : vector<16x16xf32> to vector<16x16xbf16>
    %286 = math.tanh %225 : vector<16x1xf32>
    %287 = vector.broadcast %286 : vector<16x1xf32> to vector<16x128xf32>
    %288 = arith.mulf %217, %287 : vector<16x128xf32>
    %289 = arith.truncf %288 : vector<16x128xf32> to vector<16x128xbf16>
    %cst_89 = arith.constant dense<0.000000e+00> : vector<16x128xf32>
    %290 = tpu.matmul %270, %289, %cst_89 {dimension_numbers = #tpu.dot_dimension_numbers<[1], [0], [0], [1], [0, 0, 1, 1], [], []>} : vector<16x16xbf16>, vector<16x128xbf16>, vector<16x128xf32> -> vector<16x128xf32>
    %cst_90 = arith.constant dense<0.000000e+00> : vector<16x16xf32>
    %291 = tpu.matmul %270, %186, %cst_90 {dimension_numbers = #tpu.dot_dimension_numbers<[1], [0], [0], [1], [0, 0, 1, 1], [], []>} : vector<16x16xbf16>, vector<16x16xbf16>, vector<16x16xf32> -> vector<16x16xf32>
    %292 = arith.truncf %291 : vector<16x16xf32> to vector<16x16xbf16>
    %cst_91 = arith.constant dense<0.000000e+00> : vector<16x16xf32>
    %293 = tpu.matmul %292, %285, %cst_91 {dimension_numbers = #tpu.dot_dimension_numbers<[1], [0], [0], [1], [0, 0, 1, 1], [], []>} : vector<16x16xbf16>, vector<16x16xbf16>, vector<16x16xf32> -> vector<16x16xf32>
    %294 = arith.truncf %293 : vector<16x16xf32> to vector<16x16xbf16>
    %295 = arith.extf %294 : vector<16x16xbf16> to vector<16x16xf32>
    %cst_92 = arith.constant dense<0.000000e+00> : vector<16xf32>
    %296 = vector.multi_reduction <add>, %295, %cst_92 [1] : vector<16x16xf32> to vector<16xf32>
    %297 = vector.shape_cast %296 : vector<16xf32> to vector<16x1xf32>
    %cst_93 = arith.constant 1.000000e+00 : f32
    %298 = vector.broadcast %cst_93 : f32 to vector<16x1xf32>
    %299 = arith.maximumf %297, %298 : vector<16x1xf32>
    %cst_94 = arith.constant 1.000000e+00 : f32
    %300 = vector.broadcast %cst_94 : f32 to vector<16x1xf32>
    %301 = arith.divf %300, %299 : vector<16x1xf32>
    %302 = arith.truncf %290 : vector<16x128xf32> to vector<16x128xbf16>
    %cst_95 = arith.constant dense<0.000000e+00> : vector<16x128xf32>
    %303 = tpu.matmul %294, %302, %cst_95 {dimension_numbers = #tpu.dot_dimension_numbers<[1], [0], [0], [1], [0, 0, 1, 1], [], []>} : vector<16x16xbf16>, vector<16x128xbf16>, vector<16x128xf32> -> vector<16x128xf32>
    %304 = vector.broadcast %301 : vector<16x1xf32> to vector<16x128xf32>
    %305 = arith.mulf %303, %304 : vector<16x128xf32>
    %306 = arith.truncf %305 : vector<16x128xf32> to vector<16x128xbf16>
    %c2 = arith.constant 2 : index
    %c0_96 = arith.constant 0 : index
    %c0_97 = arith.constant 0 : index
    %307 = vector.load %arg2[%c2, %c0_96, %c0_97] : memref<6x128x128xbf16, #tpu.memory_space<vmem>>, vector<1x128x128xbf16>
    %308 = vector.shape_cast %307 : vector<1x128x128xbf16> to vector<128x128xbf16>
    %cst_98 = arith.constant dense<0.000000e+00> : vector<16x128xf32>
    %309 = tpu.matmul %306, %308, %cst_98 {dimension_numbers = #tpu.dot_dimension_numbers<[1], [0], [0], [1], [0, 0, 1, 1], [], []>} : vector<16x128xbf16>, vector<128x128xbf16>, vector<16x128xf32> -> vector<16x128xf32>
    %310 = arith.truncf %290 : vector<16x128xf32> to vector<16x128xbf16>
    %c2_99 = arith.constant 2 : index
    %c0_100 = arith.constant 0 : index
    %c0_101 = arith.constant 0 : index
    %311 = vector.load %arg3[%c2_99, %c0_100, %c0_101] : memref<6x128x128xbf16, #tpu.memory_space<vmem>>, vector<1x128x128xbf16>
    %312 = vector.shape_cast %311 : vector<1x128x128xbf16> to vector<128x128xbf16>
    %cst_102 = arith.constant dense<0.000000e+00> : vector<16x128xf32>
    %313 = tpu.matmul %310, %312, %cst_102 {dimension_numbers = #tpu.dot_dimension_numbers<[1], [0], [0], [1], [0, 0, 1, 1], [], []>} : vector<16x128xbf16>, vector<128x128xbf16>, vector<16x128xf32> -> vector<16x128xf32>
    %314 = arith.addf %309, %313 : vector<16x128xf32>
    %c2_103 = arith.constant 2 : index
    %c0_104 = arith.constant 0 : index
    %c0_105 = arith.constant 0 : index
    %315 = vector.load %arg4[%c2_103, %c0_104, %c0_105] : memref<6x1x128xf32, #tpu.memory_space<vmem>>, vector<1x1x128xf32>
    %316 = vector.shape_cast %315 : vector<1x1x128xf32> to vector<1x128xf32>
    %317 = vector.broadcast %316 : vector<1x128xf32> to vector<16x128xf32>
    %318 = arith.addf %314, %317 : vector<16x128xf32>
    %cst_106 = arith.constant 0.000000e+00 : f32
    %319 = vector.broadcast %cst_106 : f32 to vector<16x128xf32>
    %320 = arith.maximumf %318, %319 : vector<16x128xf32>
    %321 = tpu.iota {dimensions = array<i32: 0>} : vector<16x128xi32>
    %c8_i32_107 = arith.constant 8 : i32
    %322 = vector.broadcast %c8_i32_107 : i32 to vector<16x128xi32>
    %323 = arith.cmpi slt, %321, %322 : vector<16x128xi32>
    %cst_108 = arith.constant 0.000000e+00 : f32
    %324 = vector.broadcast %cst_108 : f32 to vector<16x128xf32>
    %325 = arith.select %323, %320, %324 : vector<16x128xi1>, vector<16x128xf32>
    %326 = arith.truncf %325 : vector<16x128xf32> to vector<16x128xbf16>
    %cst_109 = arith.constant dense<0.000000e+00> : vector<16x128xf32>
    %327 = tpu.matmul %69, %326, %cst_109 {dimension_numbers = #tpu.dot_dimension_numbers<[1], [0], [0], [1], [0, 0, 1, 1], [], []>} : vector<16x16xbf16>, vector<16x128xbf16>, vector<16x128xf32> -> vector<16x128xf32>
    %328 = arith.extf %0 : vector<16x16xbf16> to vector<16x16xf32>
    %cst_110 = arith.constant dense<0.000000e+00> : vector<16xf32>
    %329 = vector.multi_reduction <add>, %328, %cst_110 [1] : vector<16x16xf32> to vector<16xf32>
    %330 = vector.shape_cast %329 : vector<16xf32> to vector<16x1xf32>
    %cst_111 = arith.constant 1.000000e+00 : f32
    %331 = vector.broadcast %cst_111 : f32 to vector<16x1xf32>
    %332 = arith.maximumf %330, %331 : vector<16x1xf32>
    %cst_112 = arith.constant 1.000000e+00 : f32
    %333 = vector.broadcast %cst_112 : f32 to vector<16x1xf32>
    %334 = arith.divf %333, %332 : vector<16x1xf32>
    %335 = arith.truncf %327 : vector<16x128xf32> to vector<16x128xbf16>
    %cst_113 = arith.constant dense<0.000000e+00> : vector<16x128xf32>
    %336 = tpu.matmul %0, %335, %cst_113 {dimension_numbers = #tpu.dot_dimension_numbers<[1], [0], [0], [1], [0, 0, 1, 1], [], []>} : vector<16x16xbf16>, vector<16x128xbf16>, vector<16x128xf32> -> vector<16x128xf32>
    %337 = vector.broadcast %334 : vector<16x1xf32> to vector<16x128xf32>
    %338 = arith.mulf %336, %337 : vector<16x128xf32>
    %339 = arith.truncf %338 : vector<16x128xf32> to vector<16x128xbf16>
    %c3 = arith.constant 3 : index
    %c0_114 = arith.constant 0 : index
    %c0_115 = arith.constant 0 : index
    %340 = vector.load %arg2[%c3, %c0_114, %c0_115] : memref<6x128x128xbf16, #tpu.memory_space<vmem>>, vector<1x128x128xbf16>
    %341 = vector.shape_cast %340 : vector<1x128x128xbf16> to vector<128x128xbf16>
    %cst_116 = arith.constant dense<0.000000e+00> : vector<16x128xf32>
    %342 = tpu.matmul %339, %341, %cst_116 {dimension_numbers = #tpu.dot_dimension_numbers<[1], [0], [0], [1], [0, 0, 1, 1], [], []>} : vector<16x128xbf16>, vector<128x128xbf16>, vector<16x128xf32> -> vector<16x128xf32>
    %343 = arith.truncf %327 : vector<16x128xf32> to vector<16x128xbf16>
    %c3_117 = arith.constant 3 : index
    %c0_118 = arith.constant 0 : index
    %c0_119 = arith.constant 0 : index
    %344 = vector.load %arg3[%c3_117, %c0_118, %c0_119] : memref<6x128x128xbf16, #tpu.memory_space<vmem>>, vector<1x128x128xbf16>
    %345 = vector.shape_cast %344 : vector<1x128x128xbf16> to vector<128x128xbf16>
    %cst_120 = arith.constant dense<0.000000e+00> : vector<16x128xf32>
    %346 = tpu.matmul %343, %345, %cst_120 {dimension_numbers = #tpu.dot_dimension_numbers<[1], [0], [0], [1], [0, 0, 1, 1], [], []>} : vector<16x128xbf16>, vector<128x128xbf16>, vector<16x128xf32> -> vector<16x128xf32>
    %347 = arith.addf %342, %346 : vector<16x128xf32>
    %c3_121 = arith.constant 3 : index
    %c0_122 = arith.constant 0 : index
    %c0_123 = arith.constant 0 : index
    %348 = vector.load %arg4[%c3_121, %c0_122, %c0_123] : memref<6x1x128xf32, #tpu.memory_space<vmem>>, vector<1x1x128xf32>
    %349 = vector.shape_cast %348 : vector<1x1x128xf32> to vector<1x128xf32>
    %350 = vector.broadcast %349 : vector<1x128xf32> to vector<16x128xf32>
    %351 = arith.addf %347, %350 : vector<16x128xf32>
    %cst_124 = arith.constant 0.000000e+00 : f32
    %352 = vector.broadcast %cst_124 : f32 to vector<16x128xf32>
    %353 = arith.maximumf %351, %352 : vector<16x128xf32>
    %354 = tpu.iota {dimensions = array<i32: 0>} : vector<16x128xi32>
    %c16_i32_125 = arith.constant 16 : i32
    %355 = vector.broadcast %c16_i32_125 : i32 to vector<16x128xi32>
    %356 = arith.cmpi slt, %354, %355 : vector<16x128xi32>
    %cst_126 = arith.constant 0.000000e+00 : f32
    %357 = vector.broadcast %cst_126 : f32 to vector<16x128xf32>
    %358 = arith.select %356, %353, %357 : vector<16x128xi1>, vector<16x128xf32>
    %359 = arith.extf %0 : vector<16x16xbf16> to vector<16x16xf32>
    %cst_127 = arith.constant dense<0.000000e+00> : vector<16xf32>
    %360 = vector.multi_reduction <add>, %359, %cst_127 [1] : vector<16x16xf32> to vector<16xf32>
    %361 = vector.shape_cast %360 : vector<16xf32> to vector<16x1xf32>
    %cst_128 = arith.constant 1.000000e+00 : f32
    %362 = vector.broadcast %cst_128 : f32 to vector<16x1xf32>
    %363 = arith.maximumf %361, %362 : vector<16x1xf32>
    %cst_129 = arith.constant 1.000000e+00 : f32
    %364 = vector.broadcast %cst_129 : f32 to vector<16x1xf32>
    %365 = arith.divf %364, %363 : vector<16x1xf32>
    %366 = arith.truncf %358 : vector<16x128xf32> to vector<16x128xbf16>
    %cst_130 = arith.constant dense<0.000000e+00> : vector<16x128xf32>
    %367 = tpu.matmul %0, %366, %cst_130 {dimension_numbers = #tpu.dot_dimension_numbers<[1], [0], [0], [1], [0, 0, 1, 1], [], []>} : vector<16x16xbf16>, vector<16x128xbf16>, vector<16x128xf32> -> vector<16x128xf32>
    %368 = vector.broadcast %365 : vector<16x1xf32> to vector<16x128xf32>
    %369 = arith.mulf %367, %368 : vector<16x128xf32>
    %370 = arith.truncf %369 : vector<16x128xf32> to vector<16x128xbf16>
    %c5 = arith.constant 5 : index
    %c0_131 = arith.constant 0 : index
    %c0_132 = arith.constant 0 : index
    %371 = vector.load %arg2[%c5, %c0_131, %c0_132] : memref<6x128x128xbf16, #tpu.memory_space<vmem>>, vector<1x128x128xbf16>
    %372 = vector.shape_cast %371 : vector<1x128x128xbf16> to vector<128x128xbf16>
    %cst_133 = arith.constant dense<0.000000e+00> : vector<16x128xf32>
    %373 = tpu.matmul %370, %372, %cst_133 {dimension_numbers = #tpu.dot_dimension_numbers<[1], [0], [0], [1], [0, 0, 1, 1], [], []>} : vector<16x128xbf16>, vector<128x128xbf16>, vector<16x128xf32> -> vector<16x128xf32>
    %374 = arith.truncf %358 : vector<16x128xf32> to vector<16x128xbf16>
    %c5_134 = arith.constant 5 : index
    %c0_135 = arith.constant 0 : index
    %c0_136 = arith.constant 0 : index
    %375 = vector.load %arg3[%c5_134, %c0_135, %c0_136] : memref<6x128x128xbf16, #tpu.memory_space<vmem>>, vector<1x128x128xbf16>
    %376 = vector.shape_cast %375 : vector<1x128x128xbf16> to vector<128x128xbf16>
    %cst_137 = arith.constant dense<0.000000e+00> : vector<16x128xf32>
    %377 = tpu.matmul %374, %376, %cst_137 {dimension_numbers = #tpu.dot_dimension_numbers<[1], [0], [0], [1], [0, 0, 1, 1], [], []>} : vector<16x128xbf16>, vector<128x128xbf16>, vector<16x128xf32> -> vector<16x128xf32>
    %378 = arith.addf %373, %377 : vector<16x128xf32>
    %c5_138 = arith.constant 5 : index
    %c0_139 = arith.constant 0 : index
    %c0_140 = arith.constant 0 : index
    %379 = vector.load %arg4[%c5_138, %c0_139, %c0_140] : memref<6x1x128xf32, #tpu.memory_space<vmem>>, vector<1x1x128xf32>
    %380 = vector.shape_cast %379 : vector<1x1x128xf32> to vector<1x128xf32>
    %381 = vector.broadcast %380 : vector<1x128xf32> to vector<16x128xf32>
    %382 = arith.addf %378, %381 : vector<16x128xf32>
    %383 = tpu.iota {dimensions = array<i32: 0>} : vector<16x128xi32>
    %c16_i32_141 = arith.constant 16 : i32
    %384 = vector.broadcast %c16_i32_141 : i32 to vector<16x128xi32>
    %385 = arith.cmpi slt, %383, %384 : vector<16x128xi32>
    %cst_142 = arith.constant 0.000000e+00 : f32
    %386 = vector.broadcast %cst_142 : f32 to vector<16x128xf32>
    %387 = arith.select %385, %382, %386 : vector<16x128xi1>, vector<16x128xf32>
    %c0_143 = arith.constant 0 : index
    %c0_144 = arith.constant 0 : index
    %388 = vector.load %arg5[%c0_143, %c0_144] : memref<16x128xf32, #tpu.memory_space<vmem>>, vector<16x128xf32>
    tpu.vector_store %arg5[%c0_143, %c0_144], %387 {strides = array<i32>} : memref<16x128xf32, #tpu.memory_space<vmem>>, vector<16x128xf32>,
    return
  }
}

</mosaic_0001>

<bundles_post_ra>
// kernel: graph_unet_forward.1
= control target key start
LH: loop header
LB: loop body
LE: loop exit
PB: predicated region body
PF: predicated region fallthrough
CT: control target
= control target key end

     0   :  { %v2956_v4 = vmov 0.0   ;;  %vm2957_vm0 = vmmov 0   ;;  %v25_v10 = vlaneseq  ;;  %vm56_vm6 = vcmask 130048   ;;  %s3569_s1 = inlined_call_operand.vmem [shape: f32[16,128], index: 1, kind: input, shape index: {}]   ;;  %s3570_s0 = inlined_call_operand.vmem [shape: bf16[16,16], index: 0, kind: input, shape index: {}]   ;;  %s3571_s3 = inlined_call_operand.vmem [shape: bf16[6,128,128], index: 3, kind: input, shape index: {}]   ;;  %s3572_s2 = inlined_call_operand.vmem [shape: bf16[6,128,128], index: 2, kind: input, shape index: {}]   ;;  %s3573_s4 = inlined_call_operand.vmem [shape: f32[6,1,128], index: 4, kind: input, shape index: {}]   ;;  %s3574_s5 = inlined_call_operand.vmem [shape: f32[16,128], index: 5, kind: output, shape index: {}]  }
   0x1   :  { %v23_v0 = vld [vmem:[%s3569_s1] sm:$0xff]  ;;  %v24_v1 = vld [vmem:[%s3569_s1 + $0x8] sm:$0xff]  ;;  %2538 = vmatprep.subr.bf16.mxu0 %v2956_v4  ;;  %2544 = vmatprep.subr.bf16.mxu1 %v2956_v4 }
   0x2   :  { %v30_v2 = vmul.f32 %v23_v0, %v23_v0  ;;  %v31_v3 = vmul.f32 %v24_v1, %v24_v1  ;;  %v3002_v5 = vld [vmem:[%s3570_s0] sm:$0xff]   ;;  %2540 = vmatprep.mubr.msk.bf16.mxu0 %vm2957_vm0, %v2956_v4  ;;  %2546 = vmatprep.mubr.msk.bf16.mxu1 %vm2957_vm0, %v2956_v4  ;;  %v3010_v12 = vshrl.u32 %v25_v10, 7  ;;  %v3012_v13 = vand.u32 127, %v25_v10  ;;  %v2834_v10 = vld [vmem:[%s3571_s3 + $0x38] sm:$0xff]  }
   0x3   :  { %2545 = vmatpush3.bf16.msra.mxu1 %v3002_v5 }
   0x4   :  { %32 = vadd.xlane.f32.xlu0 %v30_v2  ;;  %2556 = vmatprep.subr.bf16.mxu1 %v2956_v4  ;;  %v3015_v16 = vadd.s32 8, %v3010_v12  ;;  %vm3019_vm3 = vcmp.eq.s32.totalorder %v3010_v12, %v3012_v13  ;;  %vm72_vm8 = vcmp.lt.s32.totalorder %v3010_v12, %v3012_v13  ;;  %v3045_v51 = vcvt.s32.f32 %v3010_v12 }
   0x5   :  { %v3065_v59 = vcvt.s32.f32 %v3012_v13 }
   0x6   :  { %vm53_vm5 = vcmp.eq.s32.totalorder %v3015_v16, %v3012_v13  ;;  %vm73_vm9 = vcmp.lt.s32.totalorder %v3015_v16, %v3012_v13 }
   0x8   :  { %34 = vadd.xlane.f32.xlu0 %v31_v3 }
  0x8d   :  { %v33_v6 = vpop.xlane.xlu0 %32 }
  0x8e   :  { %v36_v7 = vadd.f32 1e-12, %v33_v6 }
  0x90   :  { %2915 = vrsqrt.f32 %v36_v7  ;;  %vm40_vm1 = vcmp.eq.f32.partialorder %v36_v7, inf  ;;  %v43_v15 = vand.u32 2147483648, %v36_v7  ;;  %vm42_vm2 = vcmp.eq.f32.partialorder %v36_v7, 0.0 }
  0x91   :  { %v35_v8 = vpop.xlane.xlu0 %34 }
  0x92   :  { %v37_v9 = vadd.f32 1e-12, %v35_v8 }
  0x94   :  { %2917 = vrsqrt.f32 %v37_v9  ;;  %vm47_vm4 = vcmp.eq.f32.partialorder %v37_v9, inf  ;;  %v50_v22 = vand.u32 2147483648, %v37_v9  ;;  %vm49_vm7 = vcmp.eq.f32.partialorder %v37_v9, 0.0 }
  0x9d   :  { %v2916_v11 = vpop.eup %2915 }
  0x9e   :  { %v39_v14 = vmul.f32 %v2916_v11, %v36_v7 }
  0xa0   :  { %v41_v17 = vsel %vm40_vm1, %v36_v7, %v39_v14 }
  0xa1   :  { %v2918_v18 = vpop.eup %2917  ;;  %v44_v19 = vsel %vm42_vm2, %v43_v15, %v41_v17 }
  0xa2   :  { %v46_v21 = vmul.f32 %v2918_v18, %v37_v9  ;;  %2919 = vtanh.f32 %v44_v19  ;;  %v54_v24 = vsel %vm3019_vm3, %v44_v19, 0.0  ;;  %v2835_v18 = vld [vmem:[%s3571_s3 + $0x30] sm:$0xff]  }
  0xa3   :  { %v57_v27 = vsel %vm56_vm6, %v54_v24, 0.0  ;;  %v2840_v24 = vld [vmem:[%s3571_s3 + $0x8] sm:$0xff]  }
  0xa4   :  { %v48_v23 = vsel %vm47_vm4, %v37_v9, %v46_v21  ;;  %vm109_vm4 = vcmp.lt.s32.totalorder %v3012_v13, 16  ;;  %v2837_v21 = vld [vmem:[%s3571_s3 + $0x20] sm:$0xff]  }
  0xa5   :  { %v51_v25 = vsel %vm49_vm7, %v50_v22, %v48_v23  ;;  %v2838_v22 = vld [vmem:[%s3571_s3 + $0x18] sm:$0xff]   ;;  %v2839_v23 = vld [vmem:[%s3571_s3 + $0x10] sm:$0xff]  }
  0xa6   :  { %2921 = vtanh.f32 %v51_v25  ;;  %v55_v26 = vsel %vm53_vm5, %v51_v25, 0.0 }
  0xa7   :  { %v58_v28 = vsel %vm56_vm6, %v55_v26, 0.0 }
  0xa8   :  { %v59_v29 = vadd.f32 %v58_v28, %v57_v27 }
  0xaa   :  { %v60_v30 = vrot.slane %v59_v29, 4 }
  0xac   :  { %v61_v31 = vadd.f32 %v60_v30, %v59_v29 }
  0xae   :  { %v62_v32 = vrot.slane %v61_v31, 2 }
  0xaf   :  { %v2920_v34 = vpop.eup %2919 }
  0xb0   :  { %v63_v33 = vadd.f32 %v62_v32, %v61_v31  ;;  %v128_v37 = vmul.f32 %v2920_v34, %v23_v0 }
  0xb2   :  { %v64_v35 = vrot.slane %v63_v33, 1 }
  0xb3   :  { %v2922_v36 = vpop.eup %2921 }
  0xb4   :  { %v129_v38 = vmul.f32 %v2922_v36, %v24_v1  ;;  %v65_v39 = vadd.f32 %v64_v35, %v63_v33  ;;  %v2958_v1 = vmov 1.0|1.0   ;;  %v2842_v35 = vld [vmem:[%s3572_s2 + $0x38] sm:$0xff]   ;;  %v2843_v36 = vld [vmem:[%s3572_s2 + $0x30] sm:$0xff]  }
  0xb6   :  { %v130_v40 = vpack.c.bf16 %v129_v38, %v128_v37  ;;  %vm68_vm10 = vcmp.gt.f32.partialorder %v44_v19, %v65_v39  ;;  %vm70_vm11 = vcmp.eq.f32.partialorder %v44_v19, %v65_v39  ;;  %vm69_vm12 = vcmp.gt.f32.partialorder %v51_v25, %v65_v39  ;;  %v2836_v19 = vld [vmem:[%s3571_s3 + $0x28] sm:$0xff]  }
  0xb7   :  { %vm71_vm13 = vcmp.eq.f32.partialorder %v51_v25, %v65_v39  ;;  %vm74_vm14 = vmand %vm70_vm11, %vm72_vm8  ;;  %v2841_v25 = vld [vmem:[%s3571_s3] sm:$0xff]   ;;  %v2844_v37 = vld [vmem:[%s3572_s2 + $0x28] sm:$0xff]  }
  0xb8   :  { %2539 = vmatpush3.bf16.msra.mxu0 %v130_v40  ;;  %vm75_vm15 = vmand %vm71_vm13, %vm73_vm9  ;;  %v2845_v39 = vld [vmem:[%s3572_s2 + $0x20] sm:$0xff]  }
  0xb9   :  { %vm76_vm1 = vmor %vm68_vm10, %vm74_vm14  ;;  %2550 = vmatprep.subr.bf16.mxu0 %v2956_v4  ;;  %vm118_vm10 = vcmp.lt.s32.totalorder %v3012_v13, 8 }
  0xba   :  { %vm77_vm2 = vmor %vm69_vm12, %vm75_vm15  ;;  %v2173_v41 = vsel %vm76_vm1, 1.0, %v2956_v4 }
  0xbb   :  { %v2174_v42 = vsel %vm77_vm2, 1.0, %v2956_v4  ;;  %v84_v43 = vsel %vm56_vm6, %v2173_v41, 0.0 }
  0xbc   :  { %v85_v44 = vsel %vm56_vm6, %v2174_v42, 0.0  ;;  %v2846_v42 = vld [vmem:[%s3572_s2 + $0x18] sm:$0xff]  }
  0xbd   :  { %v86_v45 = vadd.f32 %v85_v44, %v84_v43  ;;  %v2847_v44 = vld [vmem:[%s3572_s2 + $0x10] sm:$0xff]  }
  0xbf   :  { %v87_v46 = vrot.slane %v86_v45, 4 }
  0xc1   :  { %v88_v47 = vadd.f32 %v87_v46, %v86_v45  ;;  %v2848_v45 = vld [vmem:[%s3572_s2 + $0x8] sm:$0xff]   ;;  %v2849_v46 = vld [vmem:[%s3572_s2] sm:$0xff]  }
  0xc3   :  { %v89_v48 = vrot.slane %v88_v47, 2 }
  0xc5   :  { %v90_v49 = vadd.f32 %v89_v48, %v88_v47 }
  0xc7   :  { %v91_v50 = vrot.slane %v90_v49, 1 }
  0xc9   :  { %v92_v52 = vadd.f32 %v91_v50, %v90_v49 }
  0xcb   :  { %v93_v53 = vsel %vm3019_vm3, %v92_v52, 0.0  ;;  %vm103_vm7 = vcmp.eq.f32.partialorder %v92_v52, %v3045_v51  ;;  %v94_v56 = vsel %vm53_vm5, %v92_v52, 0.0 }
  0xcc   :  { %v95_v54 = vsel %vm56_vm6, %v93_v53, 0.0  ;;  %vm110_vm9 = vmand %vm103_vm7, %vm109_vm4  ;;  %v98_v58 = vsel %vm56_vm6, %v94_v56, 0.0 }
  0xcd   :  { %96 = vadd.xlane.f32.xlu1 %v95_v54  ;;  %v112_v55 = vsel %vm110_vm9, 1.0, %v2956_v4 }
  0xce   :  { %v114_v57 = vpack.c.bf16 %v2956_v4, %v112_v55 }
  0xd0   :  { %2541 = vmatmul.mubr.msk.bf16.vlgmr.msra.gmra.mxu0 %vm56_vm6, %v114_v57  ;;  %2547 = vmatmul.mubr.msk.bf16.vlgmr.msra.gmra.mxu1 %vm56_vm6, %v114_v57 }
  0xd1   :  { %99 = vadd.xlane.f32.xlu1 %v98_v58  ;;  %2552 = vmatprep.mubr.msk.bf16.mxu0 %vm2957_vm0, %v2956_v4 }
  0xd2   :  { %2558 = vmatprep.mubr.msk.bf16.mxu1 %vm2957_vm0, %v2956_v4 }
 0x156   :  { %v97_v60 = vpop.xlane.xlu1 %96 }
 0x157   :  { %vm116_vm11 = vcmp.eq.f32.partialorder %v97_v60, %v3065_v59 }
 0x158   :  { %vm119_vm12 = vmand %vm116_vm11, %vm118_vm10 }
 0x159   :  { %v3075_v62 = vsel %vm119_vm12, 1.0, %v2956_v4 }
 0x15a   :  { %v100_v61 = vpop.xlane.xlu1 %99 }
 0x15b   :  { %vm117_vm13 = vcmp.eq.f32.partialorder %v100_v61, %v3065_v59 }
 0x15c   :  { %vm120_vm14 = vmand %vm117_vm13, %vm118_vm10 }
 0x15d   :  { %v3078_v63 = vsel %vm120_vm14, 1.0, %v2956_v4  ;;  %vm2178_vm15 = vmpackc.low %vm120_vm14, %vm119_vm12 }
 0x15e   :  { %v125_v0 = vpack.c.bf16 %v3078_v63, %v3075_v62  ;;  %2551 = vmatpush3.bf16.msk.msra.mxu0 %vm2178_vm15, %v2958_v1  ;;  %v2885_v62 = vld [vmem:[%s3571_s3 + $0xe0] sm:$0xff]   ;;  %v2886_v63 = vld [vmem:[%s3571_s3 + $0xd8] sm:$0xff]  }
 0x15f   :  { %2562 = vmatprep.subr.bf16.mxu0 %v2956_v4 }
 0x190   :  { %v168_v2 = vpop.f32.mrf.mxu0  ;;  %v215_v3 = vpop.f32.mrf.mxu1 }
 0x192   :  { %v2542_v6 = vpop.f32.mrf.mxu0  ;;  %v2548_v7 = vpop.f32.mrf.mxu1 }
 0x194   :  { %v171_v8 = vpop.f32.mrf.mxu0  ;;  %v218_v9 = vpop.f32.mrf.mxu1 }
 0x195   :  { %v282_v11 = vpack.c.bf16 %v171_v8, %v168_v2  ;;  %v222_v14 = vpack.c.bf16 %v218_v9, %v215_v3  ;;  %v2198_v2 = vld [vmem:[%s3573_s4] ss:$0 sm:$0xff] }
 0x196   :  { %v2543_v15 = vpop.f32.mrf.mxu0  ;;  %v2549_v17 = vpop.f32.mrf.mxu1 }
 0x197   :  { %2553 = vmatmul.mubr.msk.bf16.vlgmr.msra.gmra.mxu0 %vm56_vm6, %v222_v14  ;;  %2557 = vmatpush3.bf16.msra.mxu1 %v282_v11 }
 0x198   :  { %2563 = vmatpush3.bf16.msra.mxu0 %v2834_v10  ;;  %2578 = vmatprep.mubr.msk.bf16.mxu0 %vm2957_vm0, %v2956_v4 }
 0x199   :  { %2564 = vmatprep.subr.bf16.mxu0 %v2956_v4  ;;  %2582 = vmatprep.subr.bf16.mxu1 %v2956_v4 }
 0x19c   :  { %2565 = vmatpush3.bf16.msra.mxu0 %v2835_v18 }
 0x19d   :  { %2566 = vmatprep.subr.bf16.mxu0 %v2956_v4 }
 0x1a0   :  { %2567 = vmatpush3.bf16.msra.mxu0 %v2836_v19 }
 0x1a1   :  { %2568 = vmatprep.subr.bf16.mxu0 %v2956_v4 }
 0x1a4   :  { %2569 = vmatpush3.bf16.msra.mxu0 %v2837_v21 }
 0x1a5   :  { %2570 = vmatprep.subr.bf16.mxu0 %v2956_v4 }
 0x1a8   :  { %2571 = vmatpush3.bf16.msra.mxu0 %v2838_v22 }
 0x1a9   :  { %2572 = vmatprep.subr.bf16.mxu0 %v2956_v4 }
 0x1ac   :  { %2573 = vmatpush3.bf16.msra.mxu0 %v2839_v23 }
 0x1ad   :  { %2574 = vmatprep.subr.bf16.mxu0 %v2956_v4 }
 0x1b0   :  { %2575 = vmatpush3.bf16.msra.mxu0 %v2840_v24 }
 0x1b1   :  { %2576 = vmatprep.subr.bf16.mxu0 %v2956_v4 }
 0x1b4   :  { %2577 = vmatpush3.bf16.msra.mxu0 %v2841_v25 }
 0x1b5   :  { %2602 = vmatprep.subr.bf16.mxu0 %v2956_v4 }
 0x1b7   :  { %2579 = vmatmul.mubr.bf16.vlgmr.msra.gmra.mxu0 %v282_v11 }
 0x1b8   :  { %2604 = vmatprep.mubr.msk.bf16.mxu0 %vm2957_vm0, %v2956_v4 }
 0x257   :  { %v260_v26 = vpop.f32.mrf.mxu0 }
 0x259   :  { %v2554_v27 = vpop.f32.mrf.mxu0 }
 0x25b   :  { %v263_v28 = vpop.f32.mrf.mxu0 }
 0x25c   :  { %v267_v29 = vpack.c.bf16 %v263_v28, %v260_v26 }
 0x25d   :  { %v2555_v30 = vpop.f32.mrf.mxu0 }
 0x25e   :  { %2559 = vmatmul.mubr.msk.bf16.vlgmr.msra.gmra.mxu1 %vm56_vm6, %v267_v29  ;;  %v269_v31 = vunpack.c.h.bf16 %v267_v29  ;;  %v268_v32 = vunpack.c.l.bf16 %v267_v29 }
 0x25f   :  { %2598 = vmatprep.mubr.msk.bf16.mxu1 %vm2957_vm0, %v2956_v4  ;;  %2583 = vmatpush3.bf16.msra.mxu1 %v2842_v35 }
 0x260   :  { %v273_v33 = vsel %vm56_vm6, %v269_v31, 0.0  ;;  %v270_v34 = vsel %vm56_vm6, %v268_v32, 0.0  ;;  %2584 = vmatprep.subr.bf16.mxu1 %v2956_v4 }
 0x261   :  { %274 = vadd.xlane.f32.xlu1 %v273_v33  ;;  %271 = vadd.xlane.f32.xlu0 %v270_v34 }
 0x263   :  { %2585 = vmatpush3.bf16.msra.mxu1 %v2843_v36 }
 0x264   :  { %2586 = vmatprep.subr.bf16.mxu1 %v2956_v4 }
 0x265   :  { %557 = vadd.xlane.f32.xlu1 %v2956_v4 }
 0x267   :  { %2587 = vmatpush3.bf16.msra.mxu1 %v2844_v37 }
 0x268   :  { %2588 = vmatprep.subr.bf16.mxu1 %v2956_v4 }
 0x26b   :  { %2589 = vmatpush3.bf16.msra.mxu1 %v2845_v39 }
 0x26c   :  { %2590 = vmatprep.subr.bf16.mxu1 %v2956_v4 }
 0x26f   :  { %2591 = vmatpush3.bf16.msra.mxu1 %v2846_v42 }
 0x270   :  { %2592 = vmatprep.subr.bf16.mxu1 %v2956_v4 }
 0x273   :  { %2593 = vmatpush3.bf16.msra.mxu1 %v2847_v44 }
 0x274   :  { %2594 = vmatprep.subr.bf16.mxu1 %v2956_v4 }
 0x277   :  { %v444_v38 = vpop.f32.mrf.mxu0  ;;  %2595 = vmatpush3.bf16.msra.mxu1 %v2848_v45 }
 0x278   :  { %2596 = vmatprep.subr.bf16.mxu1 %v2956_v4 }
 0x279   :  { %v2580_v40 = vpop.f32.mrf.mxu0 }
 0x27b   :  { %v447_v41 = vpop.f32.mrf.mxu0  ;;  %2597 = vmatpush3.bf16.msra.mxu1 %v2849_v46 }
 0x27c   :  { %2608 = vmatprep.subr.bf16.mxu1 %v2956_v4 }
 0x27d   :  { %v2581_v43 = vpop.f32.mrf.mxu0 }
 0x2ea   :  { %v275_v47 = vpop.xlane.xlu1 %274  ;;  %v272_v48 = vpop.xlane.xlu0 %271 }
 0x2eb   :  { %v277_v49 = vmax.f32 %v275_v47, 1.0  ;;  %v276_v50 = vmax.f32 %v272_v48, 1.0 }
 0x2ed   :  { %2923 = vrcp.f32 %v277_v49 }
 0x2ee   :  { %2925 = vrcp.f32 %v276_v50  ;;  %v558_v14 = vpop.xlane.xlu1 %557 }
 0x2ef   :  { %v560_v15 = vadd.f32 1e-12, %v558_v14 }
 0x2f1   :  { %2927 = vrsqrt.f32 %v560_v15  ;;  %vm570_vm1 = vcmp.eq.f32.partialorder %v560_v15, inf  ;;  %v573_v22 = vand.u32 2147483648, %v560_v15  ;;  %vm572_vm2 = vcmp.eq.f32.partialorder %v560_v15, 0.0 }
 0x2fa   :  { %v2924_v54 = vpop.eup %2923 }
 0x2fb   :  { %v2926_v55 = vpop.eup %2925 }
 0x2fe   :  { %v2928_v19 = vpop.eup %2927 }
 0x2ff   :  { %v569_v21 = vmul.f32 %v2928_v19, %v560_v15  ;;  %v2852_v19 = vld [vmem:[%s3571_s3 + $0x68] sm:$0xff]  }
 0x301   :  { %v571_v23 = vsel %vm570_vm1, %v560_v15, %v569_v21  ;;  %v2853_v21 = vld [vmem:[%s3571_s3 + $0x60] sm:$0xff]  }
 0x302   :  { %v574_v25 = vsel %vm572_vm2, %v573_v22, %v571_v23  ;;  %v2854_v22 = vld [vmem:[%s3571_s3 + $0x58] sm:$0xff]   ;;  %v2855_v23 = vld [vmem:[%s3571_s3 + $0x50] sm:$0xff]  }
 0x31e   :  { %v320_v52 = vpop.f32.mrf.mxu1 }
 0x31f   :  { %v327_v57 = vmul.f32 %v2926_v55, %v320_v52 }
 0x320   :  { %v2560_v53 = vpop.f32.mrf.mxu1 }
 0x322   :  { %v323_v56 = vpop.f32.mrf.mxu1 }
 0x323   :  { %v328_v58 = vmul.f32 %v2924_v54, %v323_v56 }
 0x324   :  { %v2561_v60 = vpop.f32.mrf.mxu1 }
 0x325   :  { %v329_v61 = vpack.c.bf16 %v328_v58, %v327_v57 }
 0x327   :  { %2599 = vmatmul.mubr.bf16.vlgmr.msra.gmra.mxu1 %v329_v61  ;;  %v2959_v61 = vmov 1.0  }
 0x328   :  { %2609 = vmatpush3.bf16.msra.mxu1 %v267_v29  ;;  %2610 = vmatprep.mubr.msk.bf16.mxu1 %vm2957_vm0, %v2956_v4  ;;  %v576_v29 = vsel %vm53_vm5, %v574_v25, 0.0 }
 0x329   :  { %2620 = vmatprep.subr.bf16.mxu1 %v2956_v4  ;;  %v578_v33 = vsel %vm56_vm6, %v576_v29, 0.0 }
 0x3e7   :  { %v533_v1 = vpop.f32.mrf.mxu1 }
 0x3e8   :  { %v534_v3 = vadd.f32 %v533_v1, %v444_v38  ;;  %v3193_v1 = vpack.c.bf16 %v2956_v4, %v2959_v61 }
 0x3e9   :  { %v2600_v6 = vpop.f32.mrf.mxu1 }
 0x3ea   :  { %v547_v7 = vadd.f32 %v2198_v2, %v534_v3 }
 0x3eb   :  { %v536_v8 = vpop.f32.mrf.mxu1 }
 0x3ec   :  { %v549_v9 = vmax.f32 %v547_v7, 0.0 }
 0x3ed   :  { %v2601_v10 = vpop.f32.mrf.mxu1 }
 0x3ee   :  { %v553_v11 = vmul.f32 %v549_v9, %v549_v9  ;;  %v2850_v10 = vld [vmem:[%s3571_s3 + $0x78] sm:$0xff]  }
 0x3f0   :  { %555 = vadd.xlane.f32.xlu0 %v553_v11 }
 0x479   :  { %v556_v17 = vpop.xlane.xlu0 %555 }
 0x47a   :  { %v559_v18 = vadd.f32 1e-12, %v556_v17 }
 0x47c   :  { %2929 = vrsqrt.f32 %v559_v18  ;;  %vm563_vm4 = vcmp.eq.f32.partialorder %v559_v18, inf  ;;  %v566_v27 = vand.u32 2147483648, %v559_v18  ;;  %vm565_vm7 = vcmp.eq.f32.partialorder %v559_v18, 0.0 }
 0x47d   :  { %2931 = vtanh.f32 %v574_v25  ;;  %v2857_v25 = vld [vmem:[%s3571_s3 + $0x40] sm:$0xff]  }
 0x489   :  { %v2930_v24 = vpop.eup %2929 }
 0x48a   :  { %v562_v26 = vmul.f32 %v2930_v24, %v559_v18  ;;  %v2932_v39 = vpop.eup %2931  ;;  %v2856_v24 = vld [vmem:[%s3571_s3 + $0x48] sm:$0xff]  }
 0x48b   :  { %v638_v43 = vmul.f32 0.0, %v2932_v39  ;;  %v2861_v39 = vld [vmem:[%s3572_s2 + $0x60] sm:$0xff]  }
 0x48c   :  { %v564_v28 = vsel %vm563_vm4, %v559_v18, %v562_v26  ;;  %vm2960_vm4 = vmmov 1   ;;  %v2851_v18 = vld [vmem:[%s3571_s3 + $0x70] sm:$0xff]  }
 0x48d   :  { %v567_v30 = vsel %vm565_vm7, %v566_v27, %v564_v28 }
 0x48e   :  { %v575_v31 = vsel %vm3019_vm3, %v567_v30, 0.0  ;;  %2933 = vtanh.f32 %v567_v30 }
 0x48f   :  { %v577_v32 = vsel %vm56_vm6, %v575_v31, 0.0 }
 0x490   :  { %v579_v34 = vadd.f32 %v578_v33, %v577_v32 }
 0x492   :  { %v580_v35 = vrot.slane %v579_v34, 4 }
 0x494   :  { %v581_v36 = vadd.f32 %v580_v35, %v579_v34  ;;  %v2858_v35 = vld [vmem:[%s3572_s2 + $0x78] sm:$0xff]  }
 0x496   :  { %v582_v37 = vrot.slane %v581_v36, 2 }
 0x498   :  { %v583_v38 = vadd.f32 %v582_v37, %v581_v36  ;;  %v2859_v36 = vld [vmem:[%s3572_s2 + $0x70] sm:$0xff]   ;;  %v2860_v37 = vld [vmem:[%s3572_s2 + $0x68] sm:$0xff]  }
 0x49a   :  { %v584_v40 = vrot.slane %v583_v38, 1 }
 0x49b   :  { %v2934_v41 = vpop.eup %2933 }
 0x49c   :  { %v637_v42 = vmul.f32 %v2934_v41, %v549_v9  ;;  %v585_v44 = vadd.f32 %v584_v40, %v583_v38 }
 0x49e   :  { %v639_v45 = vpack.c.bf16 %v638_v43, %v637_v42  ;;  %vm586_vm9 = vcmp.gt.f32.partialorder %v567_v30, %v585_v44  ;;  %vm588_vm11 = vcmp.eq.f32.partialorder %v567_v30, %v585_v44  ;;  %v2862_v42 = vld [vmem:[%s3572_s2 + $0x58] sm:$0xff]   ;;  %v2863_v44 = vld [vmem:[%s3572_s2 + $0x50] sm:$0xff]  }
 0x49f   :  { %vm590_vm12 = vmand %vm588_vm11, %vm72_vm8 }
 0x4a0   :  { %2603 = vmatpush3.bf16.msra.mxu0 %v639_v45  ;;  %vm592_vm13 = vmor %vm586_vm9, %vm590_vm12  ;;  %v2864_v45 = vld [vmem:[%s3572_s2 + $0x48] sm:$0xff]  }
 0x4a1   :  { %v2199_v46 = vsel %vm592_vm13, 1.0, %v2956_v4  ;;  %2614 = vmatprep.subr.bf16.mxu0 %v2956_v4 }
 0x4a2   :  { %v600_v47 = vsel %vm56_vm6, %v2199_v46, 0.0  ;;  %v2865_v46 = vld [vmem:[%s3572_s2 + $0x40] sm:$0xff]  }
 0x4a3   :  { %v603_v48 = vrot.slane %v600_v47, 4 }
 0x4a5   :  { %v604_v49 = vadd.f32 %v603_v48, %v600_v47 }
 0x4a7   :  { %v605_v50 = vrot.slane %v604_v49, 2 }
 0x4a9   :  { %v606_v52 = vadd.f32 %v605_v50, %v604_v49 }
 0x4ab   :  { %v607_v53 = vrot.slane %v606_v52, 1 }
 0x4ad   :  { %v608_v54 = vadd.f32 %v607_v53, %v606_v52 }
 0x4af   :  { %v609_v55 = vsel %vm3019_vm3, %v608_v54, 0.0  ;;  %vm617_vm14 = vcmp.eq.f32.partialorder %v608_v54, %v3045_v51 }
 0x4b0   :  { %v611_v56 = vsel %vm56_vm6, %v609_v55, 0.0  ;;  %vm621_vm15 = vmand %vm617_vm14, %vm118_vm10 }
 0x4b1   :  { %v623_v57 = vsel %vm621_vm15, 1.0, %v2956_v4  ;;  %612 = vadd.xlane.f32.xlu0 %v611_v56 }
 0x4b2   :  { %v625_v58 = vpack.c.bf16 %v2956_v4, %v623_v57 }
 0x4b4   :  { %2605 = vmatmul.mubr.msk.bf16.vlgmr.msra.gmra.mxu0 %vm56_vm6, %v625_v58  ;;  %2611 = vmatmul.mubr.msk.bf16.vlgmr.msra.gmra.mxu1 %vm56_vm6, %v625_v58 }
 0x4b5   :  { %2616 = vmatprep.mubr.msk.bf16.mxu0 %vm2957_vm0, %v2956_v4  ;;  %2622 = vmatprep.mubr.msk.bf16.mxu1 %vm2957_vm0, %v2956_v4 }
 0x53a   :  { %v613_v60 = vpop.xlane.xlu0 %612 }
 0x53b   :  { %vm626_vm1 = vcmp.eq.f32.partialorder %v613_v60, %v3065_v59 }
 0x53c   :  { %vm628_vm2 = vmand %vm626_vm1, %vm118_vm10 }
 0x53d   :  { %vm2202_vm7 = vmpackc.low %vm2960_vm4, %vm628_vm2 }
 0x53e   :  { %2615 = vmatpush3.bf16.msk.msra.mxu0 %vm2202_vm7, %v3193_v1 }
 0x53f   :  { %2626 = vmatprep.subr.bf16.mxu0 %v2956_v4 }
 0x574   :  { %v677_v2 = vpop.f32.mrf.mxu0  ;;  %v718_v3 = vpop.f32.mrf.mxu1 }
 0x576   :  { %v2606_v6 = vpop.f32.mrf.mxu0  ;;  %v2612_v7 = vpop.f32.mrf.mxu1 }
 0x578   :  { %v680_v8 = vpop.f32.mrf.mxu0  ;;  %v721_v9 = vpop.f32.mrf.mxu1 }
 0x579   :  { %v785_v11 = vpack.c.bf16 %v680_v8, %v677_v2  ;;  %v725_v14 = vpack.c.bf16 %v721_v9, %v718_v3  ;;  %v2256_v3 = vld [vmem:[%s3573_s4 + $0x1] ss:$0 sm:$0xff] }
 0x57a   :  { %v2607_v15 = vpop.f32.mrf.mxu0  ;;  %v2613_v17 = vpop.f32.mrf.mxu1 }
 0x57b   :  { %2617 = vmatmul.mubr.msk.bf16.vlgmr.msra.gmra.mxu0 %vm56_vm6, %v725_v14  ;;  %2621 = vmatpush3.bf16.msra.mxu1 %v785_v11 }
 0x57c   :  { %2627 = vmatpush3.bf16.msra.mxu0 %v2850_v10  ;;  %2642 = vmatprep.mubr.msk.bf16.mxu0 %vm2957_vm0, %v2956_v4 }
 0x57d   :  { %2628 = vmatprep.subr.bf16.mxu0 %v2956_v4  ;;  %2646 = vmatprep.subr.bf16.mxu1 %v2956_v4 }
 0x580   :  { %2629 = vmatpush3.bf16.msra.mxu0 %v2851_v18 }
 0x581   :  { %2630 = vmatprep.subr.bf16.mxu0 %v2956_v4 }
 0x584   :  { %2631 = vmatpush3.bf16.msra.mxu0 %v2852_v19 }
 0x585   :  { %2632 = vmatprep.subr.bf16.mxu0 %v2956_v4 }
 0x588   :  { %2633 = vmatpush3.bf16.msra.mxu0 %v2853_v21 }
 0x589   :  { %2634 = vmatprep.subr.bf16.mxu0 %v2956_v4 }
 0x58c   :  { %2635 = vmatpush3.bf16.msra.mxu0 %v2854_v22 }
 0x58d   :  { %2636 = vmatprep.subr.bf16.mxu0 %v2956_v4 }
 0x590   :  { %2637 = vmatpush3.bf16.msra.mxu0 %v2855_v23 }
 0x591   :  { %2638 = vmatprep.subr.bf16.mxu0 %v2956_v4 }
 0x594   :  { %2639 = vmatpush3.bf16.msra.mxu0 %v2856_v24 }
 0x595   :  { %2640 = vmatprep.subr.bf16.mxu0 %v2956_v4 }
 0x598   :  { %2641 = vmatpush3.bf16.msra.mxu0 %v2857_v25 }
 0x599   :  { %2666 = vmatprep.subr.bf16.mxu0 %v2956_v4 }
 0x59b   :  { %2643 = vmatmul.mubr.bf16.vlgmr.msra.gmra.mxu0 %v785_v11 }
 0x59c   :  { %2668 = vmatprep.mubr.msk.bf16.mxu0 %vm2957_vm0, %v2956_v4 }
 0x63b   :  { %v763_v26 = vpop.f32.mrf.mxu0 }
 0x63d   :  { %v2618_v27 = vpop.f32.mrf.mxu0 }
 0x63f   :  { %v766_v28 = vpop.f32.mrf.mxu0 }
 0x640   :  { %v770_v29 = vpack.c.bf16 %v766_v28, %v763_v26 }
 0x641   :  { %v2619_v30 = vpop.f32.mrf.mxu0 }
 0x642   :  { %2623 = vmatmul.mubr.msk.bf16.vlgmr.msra.gmra.mxu1 %vm56_vm6, %v770_v29  ;;  %v772_v31 = vunpack.c.h.bf16 %v770_v29  ;;  %v771_v32 = vunpack.c.l.bf16 %v770_v29 }
 0x643   :  { %2662 = vmatprep.mubr.msk.bf16.mxu1 %vm2957_vm0, %v2956_v4  ;;  %2647 = vmatpush3.bf16.msra.mxu1 %v2858_v35 }
 0x644   :  { %v776_v33 = vsel %vm56_vm6, %v772_v31, 0.0  ;;  %v773_v34 = vsel %vm56_vm6, %v771_v32, 0.0  ;;  %2648 = vmatprep.subr.bf16.mxu1 %v2956_v4 }
 0x645   :  { %777 = vadd.xlane.f32.xlu0 %v776_v33  ;;  %774 = vadd.xlane.f32.xlu1 %v773_v34 }
 0x647   :  { %2649 = vmatpush3.bf16.msra.mxu1 %v2859_v36 }
 0x648   :  { %2650 = vmatprep.subr.bf16.mxu1 %v2956_v4 }
 0x649   :  { %1063 = vadd.xlane.f32.xlu0 %v2956_v4 }
 0x64b   :  { %2651 = vmatpush3.bf16.msra.mxu1 %v2860_v37 }
 0x64c   :  { %2652 = vmatprep.subr.bf16.mxu1 %v2956_v4 }
 0x64f   :  { %2653 = vmatpush3.bf16.msra.mxu1 %v2861_v39 }
 0x650   :  { %2654 = vmatprep.subr.bf16.mxu1 %v2956_v4 }
 0x653   :  { %2655 = vmatpush3.bf16.msra.mxu1 %v2862_v42 }
 0x654   :  { %2656 = vmatprep.subr.bf16.mxu1 %v2956_v4 }
 0x657   :  { %2657 = vmatpush3.bf16.msra.mxu1 %v2863_v44 }
 0x658   :  { %2658 = vmatprep.subr.bf16.mxu1 %v2956_v4 }
 0x65b   :  { %v949_v38 = vpop.f32.mrf.mxu0  ;;  %2659 = vmatpush3.bf16.msra.mxu1 %v2864_v45 }
 0x65c   :  { %2660 = vmatprep.subr.bf16.mxu1 %v2956_v4 }
 0x65d   :  { %v2644_v40 = vpop.f32.mrf.mxu0 }
 0x65f   :  { %v952_v41 = vpop.f32.mrf.mxu0  ;;  %2661 = vmatpush3.bf16.msra.mxu1 %v2865_v46 }
 0x660   :  { %2672 = vmatprep.subr.bf16.mxu1 %v2956_v4 }
 0x661   :  { %v2645_v43 = vpop.f32.mrf.mxu0 }
 0x6ce   :  { %v778_v47 = vpop.xlane.xlu0 %777  ;;  %v775_v48 = vpop.xlane.xlu1 %774 }
 0x6cf   :  { %v780_v49 = vmax.f32 %v778_v47, 1.0  ;;  %v779_v50 = vmax.f32 %v775_v48, 1.0 }
 0x6d1   :  { %2935 = vrcp.f32 %v780_v49 }
 0x6d2   :  { %2937 = vrcp.f32 %v779_v50  ;;  %v1064_v15 = vpop.xlane.xlu0 %1063 }
 0x6d3   :  { %v1066_v17 = vadd.f32 1e-12, %v1064_v15  ;;  %v2872_v15 = vld [vmem:[%s3571_s3 + $0x88] sm:$0xff]  }
 0x6d5   :  { %2939 = vrsqrt.f32 %v1066_v17  ;;  %vm1076_vm9 = vcmp.eq.f32.partialorder %v1066_v17, inf  ;;  %v1079_v23 = vand.u32 2147483648, %v1066_v17  ;;  %vm1078_vm11 = vcmp.eq.f32.partialorder %v1066_v17, 0.0 }
 0x6de   :  { %v2936_v54 = vpop.eup %2935 }
 0x6df   :  { %v2938_v55 = vpop.eup %2937 }
 0x6e2   :  { %v2940_v21 = vpop.eup %2939 }
 0x6e3   :  { %v1075_v22 = vmul.f32 %v2940_v21, %v1066_v17 }
 0x6e5   :  { %v1077_v24 = vsel %vm1076_vm9, %v1066_v17, %v1075_v22  ;;  %v2873_v17 = vld [vmem:[%s3571_s3 + $0x80] sm:$0xff]  }
 0x6e6   :  { %v1080_v26 = vsel %vm1078_vm11, %v1079_v23, %v1077_v24 }
 0x6e7   :  { %v1082_v30 = vsel %vm53_vm5, %v1080_v26, 0.0 }
 0x6e8   :  { %v1084_v34 = vsel %vm56_vm6, %v1082_v30, 0.0  ;;  %v2876_v30 = vld [vmem:[%s3572_s2 + $0xa8] sm:$0xff]  }
 0x702   :  { %v823_v52 = vpop.f32.mrf.mxu1 }
 0x703   :  { %v830_v57 = vmul.f32 %v2938_v55, %v823_v52 }
 0x704   :  { %v2624_v53 = vpop.f32.mrf.mxu1 }
 0x706   :  { %v826_v56 = vpop.f32.mrf.mxu1 }
 0x707   :  { %v831_v58 = vmul.f32 %v2936_v54, %v826_v56 }
 0x708   :  { %v2625_v60 = vpop.f32.mrf.mxu1 }
 0x709   :  { %v832_v61 = vpack.c.bf16 %v831_v58, %v830_v57 }
 0x70b   :  { %2663 = vmatmul.mubr.bf16.vlgmr.msra.gmra.mxu1 %v832_v61 }
 0x70c   :  { %2673 = vmatpush3.bf16.msra.mxu1 %v770_v29  ;;  %2674 = vmatprep.mubr.msk.bf16.mxu1 %vm2957_vm0, %v2956_v4 }
 0x70d   :  { %2684 = vmatprep.subr.bf16.mxu1 %v2956_v4 }
 0x7cb   :  { %v1038_v2 = vpop.f32.mrf.mxu1 }
 0x7cc   :  { %v1039_v6 = vadd.f32 %v1038_v2, %v949_v38 }
 0x7cd   :  { %v2664_v7 = vpop.f32.mrf.mxu1 }
 0x7ce   :  { %v1053_v8 = vadd.f32 %v2256_v3, %v1039_v6  ;;  %v2866_v6 = vld [vmem:[%s3571_s3 + $0xb8] sm:$0xff]  }
 0x7cf   :  { %v1041_v9 = vpop.f32.mrf.mxu1 }
 0x7d0   :  { %v1055_v10 = vmax.f32 %v1053_v8, 0.0  ;;  %v2868_v9 = vld [vmem:[%s3571_s3 + $0xa8] sm:$0xff]  }
 0x7d1   :  { %v2665_v11 = vpop.f32.mrf.mxu1 }
 0x7d2   :  { %v1059_v14 = vmul.f32 %v1055_v10, %v1055_v10  ;;  %v2870_v11 = vld [vmem:[%s3571_s3 + $0x98] sm:$0xff]  }
 0x7d4   :  { %1061 = vadd.xlane.f32.xlu1 %v1059_v14  ;;  %v2871_v14 = vld [vmem:[%s3571_s3 + $0x90] sm:$0xff]  }
 0x85d   :  { %v1062_v18 = vpop.xlane.xlu1 %1061 }
 0x85e   :  { %v1065_v19 = vadd.f32 1e-12, %v1062_v18 }
 0x860   :  { %2941 = vrsqrt.f32 %v1065_v19  ;;  %vm1069_vm12 = vcmp.eq.f32.partialorder %v1065_v19, inf  ;;  %v1072_v28 = vand.u32 2147483648, %v1065_v19  ;;  %vm1071_vm13 = vcmp.eq.f32.partialorder %v1065_v19, 0.0 }
 0x861   :  { %2943 = vtanh.f32 %v1080_v26 }
 0x86d   :  { %v2942_v25 = vpop.eup %2941 }
 0x86e   :  { %v1068_v27 = vmul.f32 %v2942_v25, %v1065_v19  ;;  %v2944_v40 = vpop.eup %2943 }
 0x86f   :  { %v1144_v43 = vmul.f32 0.0, %v2944_v40 }
 0x870   :  { %v1070_v29 = vsel %vm1069_vm12, %v1065_v19, %v1068_v27 }
 0x871   :  { %v1073_v31 = vsel %vm1071_vm13, %v1072_v28, %v1070_v29  ;;  %v2874_v28 = vld [vmem:[%s3572_s2 + $0xb8] sm:$0xff]   ;;  %v2875_v29 = vld [vmem:[%s3572_s2 + $0xb0] sm:$0xff]  }
 0x872   :  { %v1081_v32 = vsel %vm3019_vm3, %v1073_v31, 0.0  ;;  %2945 = vtanh.f32 %v1073_v31 }
 0x873   :  { %v1083_v33 = vsel %vm56_vm6, %v1081_v32, 0.0  ;;  %v2877_v32 = vld [vmem:[%s3572_s2 + $0xa0] sm:$0xff]  }
 0x874   :  { %v1085_v35 = vadd.f32 %v1084_v34, %v1083_v33 }
 0x876   :  { %v1086_v36 = vrot.slane %v1085_v35, 4 }
 0x878   :  { %v1087_v37 = vadd.f32 %v1086_v36, %v1085_v35  ;;  %v2878_v35 = vld [vmem:[%s3572_s2 + $0x98] sm:$0xff]  }
 0x87a   :  { %v1088_v38 = vrot.slane %v1087_v37, 2 }
 0x87c   :  { %v1089_v39 = vadd.f32 %v1088_v38, %v1087_v37  ;;  %v2879_v37 = vld [vmem:[%s3572_s2 + $0x90] sm:$0xff]   ;;  %v2880_v38 = vld [vmem:[%s3572_s2 + $0x88] sm:$0xff]  }
 0x87e   :  { %v1090_v41 = vrot.slane %v1089_v39, 1 }
 0x87f   :  { %v2946_v42 = vpop.eup %2945 }
 0x880   :  { %v1143_v16 = vmul.f32 %v2946_v42, %v1055_v10  ;;  %v1091_v44 = vadd.f32 %v1090_v41, %v1089_v39  ;;  %v2869_v10 = vld [vmem:[%s3571_s3 + $0xa0] sm:$0xff]  }
 0x881   :  { %v2881_v39 = vld [vmem:[%s3572_s2 + $0x80] sm:$0xff]  }
 0x882   :  { %v1145_v45 = vpack.c.bf16 %v1144_v43, %v1143_v16  ;;  %vm1092_vm5 = vcmp.gt.f32.partialorder %v1073_v31, %v1091_v44  ;;  %vm1094_vm14 = vcmp.eq.f32.partialorder %v1073_v31, %v1091_v44 }
 0x883   :  { %vm1096_vm15 = vmand %vm1094_vm14, %vm72_vm8 }
 0x884   :  { %2667 = vmatpush3.bf16.msra.mxu0 %v1145_v45  ;;  %vm1098_vm1 = vmor %vm1092_vm5, %vm1096_vm15 }
 0x885   :  { %v2257_v46 = vsel %vm1098_vm1, 1.0, %v2956_v4  ;;  %2678 = vmatprep.subr.bf16.mxu0 %v2956_v4 }
 0x886   :  { %v1106_v47 = vsel %vm56_vm6, %v2257_v46, 0.0 }
 0x887   :  { %v1109_v48 = vrot.slane %v1106_v47, 4 }
 0x889   :  { %v1110_v49 = vadd.f32 %v1109_v48, %v1106_v47 }
 0x88b   :  { %v1111_v50 = vrot.slane %v1110_v49, 2 }
 0x88d   :  { %v1112_v52 = vadd.f32 %v1111_v50, %v1110_v49 }
 0x88f   :  { %v1113_v53 = vrot.slane %v1112_v52, 1 }
 0x891   :  { %v1114_v54 = vadd.f32 %v1113_v53, %v1112_v52 }
 0x893   :  { %v1115_v55 = vsel %vm3019_vm3, %v1114_v54, 0.0  ;;  %vm1123_vm2 = vcmp.eq.f32.partialorder %v1114_v54, %v3045_v51  ;;  %v2314_v54 = vld [vmem:[%s3573_s4 + $0x2] ss:$0 sm:$0xff] }
 0x894   :  { %v1117_v12 = vsel %vm56_vm6, %v1115_v55, 0.0  ;;  %vm1127_vm8 = vmand %vm1123_vm2, %vm118_vm10 }
 0x895   :  { %v1129_v56 = vsel %vm1127_vm8, 1.0, %v2956_v4  ;;  %1118 = vadd.xlane.f32.xlu1 %v1117_v12 }
 0x896   :  { %v1131_v57 = vpack.c.bf16 %v2956_v4, %v1129_v56 }
 0x898   :  { %2669 = vmatmul.mubr.msk.bf16.vlgmr.msra.gmra.mxu0 %vm56_vm6, %v1131_v57  ;;  %2675 = vmatmul.mubr.msk.bf16.vlgmr.msra.gmra.mxu1 %vm56_vm6, %v1131_v57 }
 0x899   :  { %2680 = vmatprep.mubr.msk.bf16.mxu0 %vm2957_vm0, %v2956_v4  ;;  %2686 = vmatprep.mubr.msk.bf16.mxu1 %vm2957_vm0, %v2956_v4 }
 0x91e   :  { %v1119_v20 = vpop.xlane.xlu1 %1118 }
 0x91f   :  { %vm1132_vm3 = vcmp.eq.f32.partialorder %v1119_v20, %v3065_v59 }
 0x920   :  { %vm1134_vm7 = vmand %vm1132_vm3, %vm118_vm10 }
 0x921   :  { %vm2260_vm9 = vmpackc.low %vm2960_vm4, %vm1134_vm7 }
 0x922   :  { %2679 = vmatpush3.bf16.msk.msra.mxu0 %vm2260_vm9, %v3193_v1  ;;  %v2867_v1 = vld [vmem:[%s3571_s3 + $0xb0] sm:$0xff]  }
 0x923   :  { %2690 = vmatprep.subr.bf16.mxu0 %v2956_v4 }
 0x958   :  { %v1183_v51 = vpop.f32.mrf.mxu0  ;;  %v1224_v58 = vpop.f32.mrf.mxu1 }
 0x95a   :  { %v2670_v60 = vpop.f32.mrf.mxu0  ;;  %v2676_v61 = vpop.f32.mrf.mxu1 }
 0x95b   :  { %v2882_v60 = vld [vmem:[%s3571_s3 + $0xf8] sm:$0xff]   ;;  %v2883_v61 = vld [vmem:[%s3571_s3 + $0xf0] sm:$0xff]  }
 0x95c   :  { %v1186_v2 = vpop.f32.mrf.mxu0  ;;  %v1227_v3 = vpop.f32.mrf.mxu1 }
 0x95d   :  { %v1291_v59 = vpack.c.bf16 %v1186_v2, %v1183_v51  ;;  %v1231_v7 = vpack.c.bf16 %v1227_v3, %v1224_v58  ;;  %v2884_v2 = vld [vmem:[%s3571_s3 + $0xe8] sm:$0xff]  }
 0x95e   :  { %v2671_v13 = vpop.f32.mrf.mxu0  ;;  %v2677_v8 = vpop.f32.mrf.mxu1  ;;  %v2888_v3 = vld [vmem:[%s3571_s3 + $0xc8] sm:$0xff]  }
 0x95f   :  { %2681 = vmatmul.mubr.msk.bf16.vlgmr.msra.gmra.mxu0 %vm56_vm6, %v1231_v7  ;;  %2685 = vmatpush3.bf16.msra.mxu1 %v1291_v59 }
 0x960   :  { %2691 = vmatpush3.bf16.msra.mxu0 %v2866_v6  ;;  %2706 = vmatprep.mubr.msk.bf16.mxu0 %vm2957_vm0, %v2956_v4  ;;  %v2889_v6 = vld [vmem:[%s3571_s3 + $0xc0] sm:$0xff]  }
 0x961   :  { %2692 = vmatprep.subr.bf16.mxu0 %v2956_v4  ;;  %2710 = vmatprep.subr.bf16.mxu1 %v2956_v4 }
 0x964   :  { %2693 = vmatpush3.bf16.msra.mxu0 %v2867_v1 }
 0x965   :  { %2694 = vmatprep.subr.bf16.mxu0 %v2956_v4 }
 0x968   :  { %2695 = vmatpush3.bf16.msra.mxu0 %v2868_v9 }
 0x969   :  { %2696 = vmatprep.subr.bf16.mxu0 %v2956_v4 }
 0x96c   :  { %2697 = vmatpush3.bf16.msra.mxu0 %v2869_v10 }
 0x96d   :  { %2698 = vmatprep.subr.bf16.mxu0 %v2956_v4 }
 0x970   :  { %2699 = vmatpush3.bf16.msra.mxu0 %v2870_v11 }
 0x971   :  { %2700 = vmatprep.subr.bf16.mxu0 %v2956_v4 }
 0x974   :  { %2701 = vmatpush3.bf16.msra.mxu0 %v2871_v14 }
 0x975   :  { %2702 = vmatprep.subr.bf16.mxu0 %v2956_v4 }
 0x978   :  { %2703 = vmatpush3.bf16.msra.mxu0 %v2872_v15 }
 0x979   :  { %2704 = vmatprep.subr.bf16.mxu0 %v2956_v4 }
 0x97c   :  { %2705 = vmatpush3.bf16.msra.mxu0 %v2873_v17  ;;  %v2890_v17 = vld [vmem:[%s3572_s2 + $0xf8] sm:$0xff]  }
 0x97d   :  { %2730 = vmatprep.subr.bf16.mxu0 %v2956_v4 }
 0x97f   :  { %2707 = vmatmul.mubr.bf16.vlgmr.msra.gmra.mxu0 %v1291_v59  ;;  %v2955_v59 = vld [vmem:[%s3570_s0] sm:$0xff]  }
 0x980   :  { %2732 = vmatprep.mubr.msk.bf16.mxu0 %vm2957_vm0, %v2956_v4  ;;  %v1610_v7 = vunpack.c.l.bf16 %v2955_v59  ;;  %v1611_v13 = vunpack.c.h.bf16 %v2955_v59 }
 0x982   :  { %v1612_v8 = vsel %vm56_vm6, %v1610_v7, 0.0  ;;  %v1615_v1 = vsel %vm56_vm6, %v1611_v13, 0.0 }
 0xa1f   :  { %v1269_v18 = vpop.f32.mrf.mxu0 }
 0xa21   :  { %v2682_v19 = vpop.f32.mrf.mxu0 }
 0xa22   :  { %v2892_v19 = vld [vmem:[%s3572_s2 + $0xe8] sm:$0xff]  }
 0xa23   :  { %v1272_v21 = vpop.f32.mrf.mxu0 }
 0xa24   :  { %v1276_v22 = vpack.c.bf16 %v1272_v21, %v1269_v18  ;;  %v2891_v18 = vld [vmem:[%s3572_s2 + $0xf0] sm:$0xff]   ;;  %v2893_v21 = vld [vmem:[%s3572_s2 + $0xe0] sm:$0xff]  }
 0xa25   :  { %v2683_v23 = vpop.f32.mrf.mxu0 }
 0xa26   :  { %2687 = vmatmul.mubr.msk.bf16.vlgmr.msra.gmra.mxu1 %vm56_vm6, %v1276_v22  ;;  %v1278_v24 = vunpack.c.h.bf16 %v1276_v22  ;;  %v1277_v25 = vunpack.c.l.bf16 %v1276_v22  ;;  %v2894_v22 = vld [vmem:[%s3572_s2 + $0xd8] sm:$0xff]   ;;  %v2895_v23 = vld [vmem:[%s3572_s2 + $0xd0] sm:$0xff]  }
 0xa27   :  { %2726 = vmatprep.mubr.msk.bf16.mxu1 %vm2957_vm0, %v2956_v4  ;;  %2711 = vmatpush3.bf16.msra.mxu1 %v2874_v28 }
 0xa28   :  { %v1282_v26 = vsel %vm56_vm6, %v1278_v24, 0.0  ;;  %v1279_v27 = vsel %vm56_vm6, %v1277_v25, 0.0  ;;  %2712 = vmatprep.subr.bf16.mxu1 %v2956_v4  ;;  %v2896_v24 = vld [vmem:[%s3572_s2 + $0xc8] sm:$0xff]   ;;  %v2897_v25 = vld [vmem:[%s3572_s2 + $0xc0] sm:$0xff]  }
 0xa29   :  { %1283 = vadd.xlane.f32.xlu1 %v1282_v26  ;;  %1280 = vadd.xlane.f32.xlu0 %v1279_v27 }
 0xa2b   :  { %2713 = vmatpush3.bf16.msra.mxu1 %v2875_v29 }
 0xa2c   :  { %2714 = vmatprep.subr.bf16.mxu1 %v2956_v4 }
 0xa2d   :  { %1613 = vadd.xlane.f32.xlu0 %v1612_v8  ;;  %1616 = vadd.xlane.f32.xlu1 %v1615_v1 }
 0xa2f   :  { %2715 = vmatpush3.bf16.msra.mxu1 %v2876_v30 }
 0xa30   :  { %2716 = vmatprep.subr.bf16.mxu1 %v2956_v4 }
 0xa33   :  { %2717 = vmatpush3.bf16.msra.mxu1 %v2877_v32 }
 0xa34   :  { %2718 = vmatprep.subr.bf16.mxu1 %v2956_v4 }
 0xa37   :  { %2719 = vmatpush3.bf16.msra.mxu1 %v2878_v35 }
 0xa38   :  { %2720 = vmatprep.subr.bf16.mxu1 %v2956_v4 }
 0xa3b   :  { %2721 = vmatpush3.bf16.msra.mxu1 %v2879_v37 }
 0xa3c   :  { %2722 = vmatprep.subr.bf16.mxu1 %v2956_v4 }
 0xa3f   :  { %v1455_v31 = vpop.f32.mrf.mxu0  ;;  %2723 = vmatpush3.bf16.msra.mxu1 %v2880_v38 }
 0xa40   :  { %2724 = vmatprep.subr.bf16.mxu1 %v2956_v4 }
 0xa41   :  { %v2708_v33 = vpop.f32.mrf.mxu0 }
 0xa43   :  { %v1458_v34 = vpop.f32.mrf.mxu0  ;;  %2725 = vmatpush3.bf16.msra.mxu1 %v2881_v39 }
 0xa44   :  { %2736 = vmatprep.subr.bf16.mxu1 %v2956_v4 }
 0xa45   :  { %v2709_v36 = vpop.f32.mrf.mxu0 }
 0xab2   :  { %v1284_v40 = vpop.xlane.xlu1 %1283  ;;  %v1281_v41 = vpop.xlane.xlu0 %1280 }
 0xab3   :  { %v1286_v42 = vmax.f32 %v1284_v40, 1.0  ;;  %v1285_v16 = vmax.f32 %v1281_v41, 1.0 }
 0xab5   :  { %2947 = vrcp.f32 %v1286_v42  ;;  %v2898_v42 = vld [vmem:[%s3571_s3 + $0x178] sm:$0xff]  }
 0xab6   :  { %2949 = vrcp.f32 %v1285_v16  ;;  %v1614_v26 = vpop.xlane.xlu0 %1613  ;;  %v1617_v27 = vpop.xlane.xlu1 %1616 }
 0xab7   :  { %v1618_v28 = vmax.f32 %v1614_v26, 1.0  ;;  %v1619_v29 = vmax.f32 %v1617_v27, 1.0 }
 0xab9   :  { %2951 = vrcp.f32 %v1618_v28 }
 0xaba   :  { %2953 = vrcp.f32 %v1619_v29 }
 0xac2   :  { %v2948_v45 = vpop.eup %2947 }
 0xac3   :  { %v2950_v46 = vpop.eup %2949 }
 0xac6   :  { %v3480_v33 = vpop.eup %2951 }
 0xac7   :  { %v3482_v35 = vpop.eup %2953 }
 0xae6   :  { %v1329_v43 = vpop.f32.mrf.mxu1 }
 0xae7   :  { %v1336_v48 = vmul.f32 %v2950_v46, %v1329_v43  ;;  %v2899_v43 = vld [vmem:[%s3571_s3 + $0x170] sm:$0xff]   ;;  %v2902_v46 = vld [vmem:[%s3571_s3 + $0x158] sm:$0xff]  }
 0xae8   :  { %v2688_v44 = vpop.f32.mrf.mxu1 }
 0xae9   :  { %v2900_v44 = vld [vmem:[%s3571_s3 + $0x168] sm:$0xff]  }
 0xaea   :  { %v1332_v47 = vpop.f32.mrf.mxu1 }
 0xaeb   :  { %v1337_v49 = vmul.f32 %v2948_v45, %v1332_v47  ;;  %v2901_v45 = vld [vmem:[%s3571_s3 + $0x160] sm:$0xff]   ;;  %v2903_v47 = vld [vmem:[%s3571_s3 + $0x150] sm:$0xff]  }
 0xaec   :  { %v2689_v50 = vpop.f32.mrf.mxu1 }
 0xaed   :  { %v1338_v52 = vpack.c.bf16 %v1337_v49, %v1336_v48  ;;  %v2904_v48 = vld [vmem:[%s3571_s3 + $0x148] sm:$0xff]   ;;  %v2905_v49 = vld [vmem:[%s3571_s3 + $0x140] sm:$0xff]  }
 0xaef   :  { %2727 = vmatmul.mubr.bf16.vlgmr.msra.gmra.mxu1 %v1338_v52 }
 0xaf0   :  { %2738 = vmatprep.mubr.msk.bf16.mxu1 %vm2957_vm0, %v2956_v4 }
 0xbaf   :  { %v1544_v53 = vpop.f32.mrf.mxu1 }
 0xbb0   :  { %v1545_v55 = vadd.f32 %v1544_v53, %v1455_v31  ;;  %v2366_v53 = vld [vmem:[%s3573_s4 + $0x3] ss:$0 sm:$0xff] }
 0xbb1   :  { %v2728_v12 = vpop.f32.mrf.mxu1 }
 0xbb2   :  { %v1559_v56 = vadd.f32 %v2314_v54, %v1545_v55 }
 0xbb3   :  { %v1547_v57 = vpop.f32.mrf.mxu1 }
 0xbb4   :  { %v1561_v20 = vmax.f32 %v1559_v56, 0.0 }
 0xbb5   :  { %v2729_v51 = vpop.f32.mrf.mxu1 }
 0xbb6   :  { %v1565_v58 = vpack.c.bf16 %v2956_v4, %v1561_v20 }
 0xbb8   :  { %2731 = vmatpush3.bf16.msra.mxu0 %v1565_v58 }
 0xbb9   :  { %2742 = vmatprep.subr.bf16.mxu0 %v2956_v4 }
 0xbbb   :  { %2733 = vmatmul.mubr.msk.bf16.vlgmr.msra.gmra.mxu0 %vm56_vm6, %v125_v0  ;;  %v2887_v0 = vld [vmem:[%s3571_s3 + $0xd0] sm:$0xff]  }
 0xbbc   :  { %2743 = vmatpush3.bf16.msra.mxu0 %v2882_v60  ;;  %2758 = vmatprep.mubr.msk.bf16.mxu0 %vm2957_vm0, %v2956_v4 }
 0xbbd   :  { %2744 = vmatprep.subr.bf16.mxu0 %v2956_v4 }
 0xbc0   :  { %2745 = vmatpush3.bf16.msra.mxu0 %v2883_v61  ;;  %v2906_v61 = vld [vmem:[%s3572_s2 + $0x178] sm:$0xff]  }
 0xbc1   :  { %2746 = vmatprep.subr.bf16.mxu0 %v2956_v4 }
 0xbc4   :  { %2747 = vmatpush3.bf16.msra.mxu0 %v2884_v2  ;;  %v2907_v2 = vld [vmem:[%s3572_s2 + $0x170] sm:$0xff]  }
 0xbc5   :  { %2748 = vmatprep.subr.bf16.mxu0 %v2956_v4 }
 0xbc8   :  { %2749 = vmatpush3.bf16.msra.mxu0 %v2885_v62  ;;  %v2908_v62 = vld [vmem:[%s3572_s2 + $0x168] sm:$0xff]  }
 0xbc9   :  { %2750 = vmatprep.subr.bf16.mxu0 %v2956_v4 }
 0xbcc   :  { %2751 = vmatpush3.bf16.msra.mxu0 %v2886_v63  ;;  %v2910_v63 = vld [vmem:[%s3572_s2 + $0x158] sm:$0xff]  }
 0xbcd   :  { %2752 = vmatprep.subr.bf16.mxu0 %v2956_v4 }
 0xbd0   :  { %2753 = vmatpush3.bf16.msra.mxu0 %v2887_v0  ;;  %v2911_v0 = vld [vmem:[%s3572_s2 + $0x150] sm:$0xff]  }
 0xbd1   :  { %2754 = vmatprep.subr.bf16.mxu0 %v2956_v4 }
 0xbd4   :  { %2755 = vmatpush3.bf16.msra.mxu0 %v2888_v3  ;;  %v2912_v3 = vld [vmem:[%s3572_s2 + $0x148] sm:$0xff]  }
 0xbd5   :  { %2756 = vmatprep.subr.bf16.mxu0 %v2956_v4 }
 0xbd8   :  { %2757 = vmatpush3.bf16.msra.mxu0 %v2889_v6  ;;  %v2913_v6 = vld [vmem:[%s3572_s2 + $0x140] sm:$0xff]  }
 0xbd9   :  { %2782 = vmatprep.subr.bf16.mxu0 %v2956_v4 }
 0xc7b   :  { %v1603_v9 = vpop.f32.mrf.mxu0 }
 0xc7d   :  { %v2734_v10 = vpop.f32.mrf.mxu0 }
 0xc7f   :  { %v1606_v11 = vpop.f32.mrf.mxu0 }
 0xc80   :  { %v1624_v14 = vpack.c.bf16 %v1606_v11, %v1603_v9 }
 0xc81   :  { %v2735_v15 = vpop.f32.mrf.mxu0 }
 0xc82   :  { %2737 = vmatpush3.bf16.msra.mxu1 %v1624_v14  ;;  %2759 = vmatmul.mubr.bf16.vlgmr.msra.gmra.mxu0 %v1624_v14 }
 0xc83   :  { %2762 = vmatprep.subr.bf16.mxu1 %v2956_v4  ;;  %2784 = vmatprep.mubr.msk.bf16.mxu0 %vm2957_vm0, %v2956_v4 }
 0xc85   :  { %2739 = vmatmul.mubr.msk.bf16.vlgmr.msra.gmra.mxu1 %vm56_vm6, %v3002_v5 }
 0xc86   :  { %2763 = vmatpush3.bf16.msra.mxu1 %v2890_v17  ;;  %2778 = vmatprep.mubr.msk.bf16.mxu1 %vm2957_vm0, %v2956_v4 }
 0xc87   :  { %2764 = vmatprep.subr.bf16.mxu1 %v2956_v4 }
 0xc8a   :  { %2765 = vmatpush3.bf16.msra.mxu1 %v2891_v18  ;;  %v2417_v18 = vld [vmem:[%s3573_s4 + $0x5] ss:$0 sm:$0xff] }
 0xc8b   :  { %2766 = vmatprep.subr.bf16.mxu1 %v2956_v4 }
 0xc8e   :  { %2767 = vmatpush3.bf16.msra.mxu1 %v2892_v19 }
 0xc8f   :  { %2768 = vmatprep.subr.bf16.mxu1 %v2956_v4 }
 0xc92   :  { %2769 = vmatpush3.bf16.msra.mxu1 %v2893_v21 }
 0xc93   :  { %2770 = vmatprep.subr.bf16.mxu1 %v2956_v4 }
 0xc96   :  { %2771 = vmatpush3.bf16.msra.mxu1 %v2894_v22 }
 0xc97   :  { %2772 = vmatprep.subr.bf16.mxu1 %v2956_v4 }
 0xc9a   :  { %2773 = vmatpush3.bf16.msra.mxu1 %v2895_v23 }
 0xc9b   :  { %2774 = vmatprep.subr.bf16.mxu1 %v2956_v4 }
 0xc9e   :  { %2775 = vmatpush3.bf16.msra.mxu1 %v2896_v24 }
 0xc9f   :  { %2776 = vmatprep.subr.bf16.mxu1 %v2956_v4 }
 0xca2   :  { %2777 = vmatpush3.bf16.msra.mxu1 %v2897_v25 }
 0xca3   :  { %2788 = vmatprep.subr.bf16.mxu1 %v2956_v4 }
 0xd42   :  { %v1788_v30 = vpop.f32.mrf.mxu0 }
 0xd44   :  { %v2760_v31 = vpop.f32.mrf.mxu0 }
 0xd45   :  { %v1662_v32 = vpop.f32.mrf.mxu1 }
 0xd46   :  { %v1791_v34 = vpop.f32.mrf.mxu0  ;;  %v1669_v39 = vmul.f32 %v3480_v33, %v1662_v32 }
 0xd47   :  { %v2740_v36 = vpop.f32.mrf.mxu1 }
 0xd48   :  { %v2761_v37 = vpop.f32.mrf.mxu0 }
 0xd49   :  { %v1665_v38 = vpop.f32.mrf.mxu1 }
 0xd4a   :  { %v1670_v40 = vmul.f32 %v3482_v35, %v1665_v38 }
 0xd4b   :  { %v2741_v41 = vpop.f32.mrf.mxu1 }
 0xd4c   :  { %v1671_v16 = vpack.c.bf16 %v1670_v40, %v1669_v39 }
 0xd4e   :  { %2779 = vmatmul.mubr.bf16.vlgmr.msra.gmra.mxu1 %v1671_v16 }
 0xd4f   :  { %2789 = vmatpush3.bf16.msra.mxu1 %v2898_v42  ;;  %2804 = vmatprep.mubr.msk.bf16.mxu1 %vm2957_vm0, %v2956_v4 }
 0xd50   :  { %2790 = vmatprep.subr.bf16.mxu1 %v2956_v4 }
 0xd53   :  { %2791 = vmatpush3.bf16.msra.mxu1 %v2899_v43 }
 0xd54   :  { %2792 = vmatprep.subr.bf16.mxu1 %v2956_v4 }
 0xd57   :  { %2793 = vmatpush3.bf16.msra.mxu1 %v2900_v44 }
 0xd58   :  { %2794 = vmatprep.subr.bf16.mxu1 %v2956_v4 }
 0xd5b   :  { %2795 = vmatpush3.bf16.msra.mxu1 %v2901_v45 }
 0xd5c   :  { %2796 = vmatprep.subr.bf16.mxu1 %v2956_v4 }
 0xd5f   :  { %2797 = vmatpush3.bf16.msra.mxu1 %v2902_v46 }
 0xd60   :  { %2798 = vmatprep.subr.bf16.mxu1 %v2956_v4 }
 0xd63   :  { %2799 = vmatpush3.bf16.msra.mxu1 %v2903_v47 }
 0xd64   :  { %2800 = vmatprep.subr.bf16.mxu1 %v2956_v4 }
 0xd67   :  { %2801 = vmatpush3.bf16.msra.mxu1 %v2904_v48 }
 0xd68   :  { %2802 = vmatprep.subr.bf16.mxu1 %v2956_v4 }
 0xd6b   :  { %2803 = vmatpush3.bf16.msra.mxu1 %v2905_v49 }
 0xe0e   :  { %v1877_v50 = vpop.f32.mrf.mxu1 }
 0xe0f   :  { %v1878_v52 = vadd.f32 %v1877_v50, %v1788_v30 }
 0xe10   :  { %v2780_v54 = vpop.f32.mrf.mxu1 }
 0xe11   :  { %v1892_v12 = vadd.f32 %v2366_v53, %v1878_v52 }
 0xe12   :  { %v1880_v55 = vpop.f32.mrf.mxu1 }
 0xe13   :  { %v1881_v56 = vadd.f32 %v1880_v55, %v1791_v34  ;;  %v1894_v51 = vmax.f32 %v1892_v12, 0.0 }
 0xe14   :  { %v2781_v57 = vpop.f32.mrf.mxu1 }
 0xe15   :  { %v1893_v20 = vadd.f32 %v2366_v53, %v1881_v56 }
 0xe17   :  { %v1895_v58 = vmax.f32 %v1893_v20, 0.0 }
 0xe19   :  { %v1898_v60 = vpack.c.bf16 %v1895_v58, %v1894_v51 }
 0xe1b   :  { %2783 = vmatpush3.bf16.msra.mxu0 %v1898_v60  ;;  %2805 = vmatmul.mubr.bf16.vlgmr.msra.gmra.mxu1 %v1898_v60 }
 0xe1c   :  { %2808 = vmatprep.subr.bf16.mxu0 %v2956_v4 }
 0xe1e   :  { %2785 = vmatmul.mubr.msk.bf16.vlgmr.msra.gmra.mxu0 %vm56_vm6, %v3002_v5  ;;  %v2909_v5 = vld [vmem:[%s3572_s2 + $0x160] sm:$0xff]  }
 0xe1f   :  { %2809 = vmatpush3.bf16.msra.mxu0 %v2906_v61  ;;  %2824 = vmatprep.mubr.msk.bf16.mxu0 %vm2957_vm0, %v2956_v4 }
 0xe20   :  { %2810 = vmatprep.subr.bf16.mxu0 %v2956_v4 }
 0xe23   :  { %2811 = vmatpush3.bf16.msra.mxu0 %v2907_v2 }
 0xe24   :  { %2812 = vmatprep.subr.bf16.mxu0 %v2956_v4 }
 0xe27   :  { %2813 = vmatpush3.bf16.msra.mxu0 %v2908_v62 }
 0xe28   :  { %2814 = vmatprep.subr.bf16.mxu0 %v2956_v4 }
 0xe2b   :  { %2815 = vmatpush3.bf16.msra.mxu0 %v2909_v5 }
 0xe2c   :  { %2816 = vmatprep.subr.bf16.mxu0 %v2956_v4 }
 0xe2f   :  { %2817 = vmatpush3.bf16.msra.mxu0 %v2910_v63 }
 0xe30   :  { %2818 = vmatprep.subr.bf16.mxu0 %v2956_v4 }
 0xe33   :  { %2819 = vmatpush3.bf16.msra.mxu0 %v2911_v0 }
 0xe34   :  { %2820 = vmatprep.subr.bf16.mxu0 %v2956_v4 }
 0xe37   :  { %2821 = vmatpush3.bf16.msra.mxu0 %v2912_v3 }
 0xe38   :  { %2822 = vmatprep.subr.bf16.mxu0 %v2956_v4 }
 0xe3b   :  { %2823 = vmatpush3.bf16.msra.mxu0 %v2913_v6 }
 0xedb   :  { %v2059_v59 = vpop.f32.mrf.mxu1 }
 0xedd   :  { %v2806_v7 = vpop.f32.mrf.mxu1 }
 0xede   :  { %v1933_v13 = vpop.f32.mrf.mxu0 }
 0xedf   :  { %v2062_v8 = vpop.f32.mrf.mxu1  ;;  %v1940_v11 = vmul.f32 %v3480_v33, %v1933_v13 }
 0xee0   :  { %v2786_v1 = vpop.f32.mrf.mxu0 }
 0xee1   :  { %v2807_v9 = vpop.f32.mrf.mxu1 }
 0xee2   :  { %v1936_v10 = vpop.f32.mrf.mxu0 }
 0xee3   :  { %v1941_v14 = vmul.f32 %v3482_v35, %v1936_v10 }
 0xee4   :  { %v2787_v15 = vpop.f32.mrf.mxu0 }
 0xee5   :  { %v1942_v17 = vpack.c.bf16 %v1941_v14, %v1940_v11 }
 0xee7   :  { %2825 = vmatmul.mubr.bf16.vlgmr.msra.gmra.mxu0 %v1942_v17 }
 0xfa7   :  { %v2148_v4 = vpop.f32.mrf.mxu0 }
 0xfa8   :  { %v2149_v19 = vadd.f32 %v2148_v4, %v2059_v59 }
 0xfa9   :  { %v2826_v21 = vpop.f32.mrf.mxu0 }
 0xfaa   :  { %v2163_v22 = vadd.f32 %v2417_v18, %v2149_v19 }
 0xfab   :  { %v2151_v23 = vpop.f32.mrf.mxu0 }
 0xfac   :  { %2167 = vst [vmem:[%s3574_s5] sm:$0xff] %v2163_v22  ;;  %v2152_v24 = vadd.f32 %v2151_v23, %v2062_v8 }
 0xfad   :  { %v2827_v25 = vpop.f32.mrf.mxu0 }
 0xfae   :  { %v2164_v26 = vadd.f32 %v2417_v18, %v2152_v24 }
 0xfb0   :  { %2168 = vst [vmem:[%s3574_s5 + $0x8] sm:$0xff] %v2164_v26 }

</bundles_post_ra>
